<compile_context>
chip_gen: v7x
topology: tpu7x:2x2x1
jax: 0.10.0
libtpu: 0.0.40
codegen_flags: <defaults>
</compile_context>

<pallas_src>
import functools

import jax
import jax.numpy as jnp
from jax.experimental import pallas as pl
from jax.experimental.pallas import tpu as pltpu

G = 16          # GroupNorm groups (nn.GroupNorm(16, channel))
K = 7           # depthwise conv kernel size
PAD = K // 2    # conv padding
EPS = 1e-5      # PyTorch GroupNorm default eps


def _build_constants(C, H, W):
    """Constant matrices for pooling (+padding) and attention expansion."""
    Cg = C // G
    HW = H * W
    Hp, Wp = H + 2 * PAD, W + 2 * PAD
    j = jnp.arange(Cg)[:, None, None]
    h = jnp.arange(H)[None, :, None]
    w = jnp.arange(W)[None, None, :]
    rows = (j * HW + h * W + w).reshape(-1)                       # lane index in x_g row

    # x_g[g] (Cg*HW,) @ ph_pad -> padded W-mean, laid out as [j*Hp + PAD + h]
    ph_cols = jnp.broadcast_to(j * Hp + PAD + h, (Cg, H, W)).reshape(-1)
    ph_pad = jnp.zeros((Cg * HW, Cg * Hp), jnp.float32).at[rows, ph_cols].set(1.0 / W)
    # x_g[g] (Cg*HW,) @ pw_pad -> padded H-mean, laid out as [j*Wp + PAD + w]
    pw_cols = jnp.broadcast_to(j * Wp + PAD + w, (Cg, H, W)).reshape(-1)
    pw_pad = jnp.zeros((Cg * HW, Cg * Wp), jnp.float32).at[rows, pw_cols].set(1.0 / H)

    # attention (G, Cg*H) @ eh -> lane-dense (G, Cg*HW): column j*HW+h*W+w <- row j*H+h
    eh_rows = jnp.broadcast_to(j * H + h, (Cg, H, W)).reshape(-1)
    eh = jnp.zeros((Cg * H, Cg * HW), jnp.float32).at[eh_rows, rows].set(1.0)
    # attention (G, Cg*W) @ ew -> lane-dense (G, Cg*HW): column j*HW+h*W+w <- row j*W+w
    ew_rows = jnp.broadcast_to(j * W + w, (Cg, H, W)).reshape(-1)
    ew = jnp.zeros((Cg * W, Cg * HW), jnp.float32).at[ew_rows, rows].set(1.0)
    return ph_pad, pw_pad, eh, ew


def _expand_affine(p, L):
    """(C,) -> (G, Cg*L) with value p[g*Cg + j] at column j*L + l (contiguous groups)."""
    Cg = p.shape[0] // G
    return jnp.repeat(p.reshape(G, Cg), L, axis=1)


def _pick_batch_block(B, slab_bytes, budget_bytes=20 << 20):
    """Batch images per grid step: big blocks, but fit VMEM and keep >=2 grid steps."""
    cap = max(1, budget_bytes // (4 * slab_bytes))     # in+out slabs, double-buffered
    if B >= 2:
        cap = min(cap, B // 2)                         # feed both v7x TensorCores
    bt = 1
    for d in range(1, int(min(cap, B)) + 1):
        if B % d == 0:
            bt = d
    return bt


def _ela_kernel(x_ref, ph_ref, pw_ref, w2_ref, gh_ref, bh_ref, gw_ref, bw_ref,
                eh_ref, ew_ref, out_ref, *, bt, Cg, H, W):
    Hp, Wp = H + 2 * PAD, W + 2 * PAD
    ph = ph_ref[...]            # (Cg*HW, Cg*Hp)   pooling + zero padding (W-mean)
    pw = pw_ref[...]            # (Cg*HW, Cg*Wp)   pooling + zero padding (H-mean)
    w2 = w2_ref[...]            # (G, Cg*K)        depthwise conv weights
    gh, bh = gh_ref[...], bh_ref[...]   # (G, Cg*H) GroupNorm affine (H branch)
    gw, bw = gw_ref[...], bw_ref[...]   # (G, Cg*W) GroupNorm affine (W branch)
    eh, ew = eh_ref[...], ew_ref[...]   # expansion matrices -> (G, Cg*HW)

    def branch(vp, L, Lp, gamma_e, beta_e):
        """depthwise conv1d(k=7, pad=3) + GroupNorm(G) + sigmoid on padded pooled vp."""
        blocks = []
        for j in range(Cg):                               # channel-within-group blocks
            base = j * Lp
            yj = w2[:, j * K:j * K + 1] * vp[:, base:base + L]
            for k in range(1, K):                         # static unrolled taps (VPU)
                wk = w2[:, j * K + k:j * K + k + 1]       # (G, 1)
                yj = yj + wk * vp[:, base + k:base + k + L]
            blocks.append(yj)
        y = blocks[0] if Cg == 1 else jnp.concatenate(blocks, axis=1)   # (G, Cg*L)
        # GroupNorm stats: group members live on the lane axis -> plain reductions.
        n = Cg * L
        mean = jnp.sum(y, axis=1, keepdims=True) * (1.0 / n)            # (G, 1)
        d = y - mean                                                    # two-pass var
        var = jnp.sum(d * d, axis=1, keepdims=True) * (1.0 / n)
        yn = d * jax.lax.rsqrt(var + EPS) * gamma_e + beta_e
        return jax.nn.sigmoid(yn)                                       # (G, Cg*L)

    for i in range(bt):                                   # static unroll over batch block
        xb = x_ref[i].astype(jnp.float32)                                 # (G, Cg*HW)
        vhp = jnp.dot(xb, ph, preferred_element_type=jnp.float32)         # (G, Cg*Hp)
        vwp = jnp.dot(xb, pw, preferred_element_type=jnp.float32)         # (G, Cg*Wp)
        ah = branch(vhp, H, Hp, gh, bh)                                   # (G, Cg*H)
        aw = branch(vwp, W, Wp, gw, bw)                                   # (G, Cg*W)
        att = (jnp.dot(ah, eh, preferred_element_type=jnp.float32) *
               jnp.dot(aw, ew, preferred_element_type=jnp.float32))       # (G, Cg*HW)
        out_ref[i] = (xb * att).astype(out_ref.dtype)


def ela_forward(x, conv_w, gamma, beta):
    """x: (B, C, H, W); conv_w: (C, K) (Conv1d(C,C,K,groups=C,bias=False) weight squeezed);
    gamma, beta: (C,) GroupNorm affine parameters. Returns (B, C, H, W)."""
    B, C, H, W = x.shape
    assert C % G == 0, "channel must be divisible by 16 (GroupNorm(16, channel))"
    Cg = C // G
    HW = H * W
    Hp, Wp = H + 2 * PAD, W + 2 * PAD

    ph_pad, pw_pad, eh, ew = _build_constants(C, H, W)
    w2 = conv_w.astype(jnp.float32).reshape(G, Cg * K)
    gh = _expand_affine(gamma.astype(jnp.float32), H)
    bh = _expand_affine(beta.astype(jnp.float32), H)
    gw = _expand_affine(gamma.astype(jnp.float32), W)
    bw = _expand_affine(beta.astype(jnp.float32), W)

    # Lane-dense grouped view: free reshape of contiguous NCHW in HBM.
    xg = x.reshape(B, G, Cg * HW)

    itemsize = jnp.dtype(x.dtype).itemsize
    slab = C * HW * itemsize
    bt = _pick_batch_block(B, slab)
    grid = (B // bt,)

    const_list = [ph_pad, pw_pad, w2, gh, bh, gw, bw, eh, ew]
    const_bytes = sum(int(c.size) * 4 for c in const_list)
    vmem_need = 4 * bt * slab + 2 * const_bytes + (4 << 20)
    vmem_limit = int(min(64 << 20, max(16 << 20, vmem_need)))   # re-derived per block; safe on v7x 64 MiB

    cost = pl.CostEstimate(
        flops=int(B * (2 * C * HW
                       + 2 * G * (Cg * HW) * (Cg * (Hp + Wp))
                       + 2 * G * Cg * (H + W) * (Cg * HW)
                       + 2 * C * (H + W) * K)),
        transcendentals=int(B * C * (H + W)),
        bytes_accessed=int(2 * B * C * HW * itemsize),
    )

    kernel = functools.partial(_ela_kernel, bt=bt, Cg=Cg, H=H, W=W)

    def const_spec(a):
        return pl.BlockSpec(a.shape, lambda b: (0,) * a.ndim)

    out = pl.pallas_call(
        kernel,
        out_shape=jax.ShapeDtypeStruct((B, G, Cg * HW), x.dtype),
        grid_spec=pltpu.PrefetchScalarGridSpec(
            num_scalar_prefetch=0,
            grid=grid,
            in_specs=[pl.BlockSpec((bt, G, Cg * HW), lambda b: (b, 0, 0))]
                     + [const_spec(c) for c in const_list],
            out_specs=pl.BlockSpec((bt, G, Cg * HW), lambda b: (b, 0, 0)),
        ),
        compiler_params=pltpu.CompilerParams(
            dimension_semantics=("parallel",),
            vmem_limit_bytes=vmem_limit,
        ),
        cost_estimate=cost,
    )(xg, *const_list)
    return out.reshape(B, C, H, W)


def ela_reference(x, conv_w, gamma, beta):
    """Pure-JAX reference matching the PyTorch module (flag=True path)."""
    def conv1d_dw(v):                       # v: (B, C, L)
        L = v.shape[-1]
        vp = jnp.pad(v, ((0, 0), (0, 0), (PAD, PAD)))
        return sum(conv_w[:, k][None, :, None] * vp[:, :, k:k + L] for k in range(K))

    def gn(y):                              # y: (B, C, L)
        Bb, Cc, L = y.shape
        yr = y.reshape(Bb, G, (Cc // G) * L)
        m = yr.mean(-1, keepdims=True)
        v = yr.var(-1, keepdims=True)
        yn = ((yr - m) * jax.lax.rsqrt(v + EPS)).reshape(Bb, Cc, L)
        return yn * gamma[None, :, None] + beta[None, :, None]

    x_h = x.mean(axis=3)                    # (B, C, H)
    x_w = x.mean(axis=2)                    # (B, C, W)
    a_h = jax.nn.sigmoid(gn(conv1d_dw(x_h)))[:, :, :, None]
    a_w = jax.nn.sigmoid(gn(conv1d_dw(x_w)))[:, :, None, :]
    return x * a_h * a_w


if __name__ == "__main__":
    key = jax.random.PRNGKey(0)
    kx, kw, kg, kb = jax.random.split(key, 4)

    B, C, H, W = 2, 32, 16, 16              # GroupNorm(16, C) requires C % 16 == 0

    def bf16_exact(a):
        # Test data rounded to bf16-representable values so the correctness check is
        # insensitive to how the MXU handles f32 matmul inputs.
        return a.astype(jnp.bfloat16).astype(jnp.float32)

    x = bf16_exact(jax.random.normal(kx, (B, C, H, W), jnp.float32))
    conv_w = bf16_exact(0.2 * jax.random.normal(kw, (C, K), jnp.float32))
    gamma = bf16_exact(1.0 + 0.1 * jax.random.normal(kg, (C,), jnp.float32))
    beta = bf16_exact(0.1 * jax.random.normal(kb, (C,), jnp.float32))

    out = ela_forward(x, conv_w, gamma, beta)
    out = jax.block_until_ready(out)

    ref = ela_reference(x, conv_w, gamma, beta)
    assert out.shape == (B, C, H, W)
    err = float(jnp.max(jnp.abs(out - ref)))
    assert jnp.allclose(out, ref, atol=2e-3, rtol=2e-2), f"kernel != reference (max abs err {err})"
    print("KERNEL_OK")
</pallas_src>

<mosaic_0001>
module attributes {stable_mosaic.version = 11 : i64} {
  func.func @_ela_kernel(%arg0: i32, %arg1: memref<1x16x512xf32, #tpu.memory_space<vmem>>, %arg2: memref<512x44xf32, #tpu.memory_space<vmem>>, %arg3: memref<512x44xf32, #tpu.memory_space<vmem>>, %arg4: memref<16x14xf32, #tpu.memory_space<vmem>>, %arg5: memref<16x32xf32, #tpu.memory_space<vmem>>, %arg6: memref<16x32xf32, #tpu.memory_space<vmem>>, %arg7: memref<16x32xf32, #tpu.memory_space<vmem>>, %arg8: memref<16x32xf32, #tpu.memory_space<vmem>>, %arg9: memref<32x512xf32, #tpu.memory_space<vmem>>, %arg10: memref<32x512xf32, #tpu.memory_space<vmem>>, %arg11: memref<1x16x512xf32, #tpu.memory_space<vmem>>) attributes {dimension_semantics = [#tpu.dimension_semantics<parallel>], iteration_bounds = array<i64: 2>, scalar_prefetch = 0 : i64, scratch_operands = 0 : i64, tpu.core_type = #tpu.core_type<tc>, window_params = [{transform_indices = @transform_0, window_bounds = array<i64: 1, 16, 512>}, {pipeline_mode = #tpu.pipeline_mode<synchronous>, transform_indices = @transform_1, window_bounds = array<i64: 512, 44>}, {pipeline_mode = #tpu.pipeline_mode<synchronous>, transform_indices = @transform_2, window_bounds = array<i64: 512, 44>}, {pipeline_mode = #tpu.pipeline_mode<synchronous>, transform_indices = @transform_3, window_bounds = array<i64: 16, 14>}, {pipeline_mode = #tpu.pipeline_mode<synchronous>, transform_indices = @transform_4, window_bounds = array<i64: 16, 32>}, {pipeline_mode = #tpu.pipeline_mode<synchronous>, transform_indices = @transform_5, window_bounds = array<i64: 16, 32>}, {pipeline_mode = #tpu.pipeline_mode<synchronous>, transform_indices = @transform_6, window_bounds = array<i64: 16, 32>}, {pipeline_mode = #tpu.pipeline_mode<synchronous>, transform_indices = @transform_7, window_bounds = array<i64: 16, 32>}, {pipeline_mode = #tpu.pipeline_mode<synchronous>, transform_indices = @transform_8, window_bounds = array<i64: 32, 512>}, {pipeline_mode = #tpu.pipeline_mode<synchronous>, transform_indices = @transform_9, window_bounds = array<i64: 32, 512>}, {transform_indices = @transform_10, window_bounds = array<i64: 1, 16, 512>}]} {
    %c0 = arith.constant 0 : index
    %c0_0 = arith.constant 0 : index
    %0 = vector.load %arg2[%c0, %c0_0] : memref<512x44xf32, #tpu.memory_space<vmem>>, vector<512x44xf32>
    %c0_1 = arith.constant 0 : index
    %c0_2 = arith.constant 0 : index
    %1 = vector.load %arg3[%c0_1, %c0_2] : memref<512x44xf32, #tpu.memory_space<vmem>>, vector<512x44xf32>
    %c0_3 = arith.constant 0 : index
    %c0_4 = arith.constant 0 : index
    %2 = vector.load %arg4[%c0_3, %c0_4] : memref<16x14xf32, #tpu.memory_space<vmem>>, vector<16x14xf32>
    %c0_5 = arith.constant 0 : index
    %c0_6 = arith.constant 0 : index
    %3 = vector.load %arg5[%c0_5, %c0_6] : memref<16x32xf32, #tpu.memory_space<vmem>>, vector<16x32xf32>
    %c0_7 = arith.constant 0 : index
    %c0_8 = arith.constant 0 : index
    %4 = vector.load %arg6[%c0_7, %c0_8] : memref<16x32xf32, #tpu.memory_space<vmem>>, vector<16x32xf32>
    %c0_9 = arith.constant 0 : index
    %c0_10 = arith.constant 0 : index
    %5 = vector.load %arg7[%c0_9, %c0_10] : memref<16x32xf32, #tpu.memory_space<vmem>>, vector<16x32xf32>
    %c0_11 = arith.constant 0 : index
    %c0_12 = arith.constant 0 : index
    %6 = vector.load %arg8[%c0_11, %c0_12] : memref<16x32xf32, #tpu.memory_space<vmem>>, vector<16x32xf32>
    %c0_13 = arith.constant 0 : index
    %c0_14 = arith.constant 0 : index
    %7 = vector.load %arg9[%c0_13, %c0_14] : memref<32x512xf32, #tpu.memory_space<vmem>>, vector<32x512xf32>
    %c0_15 = arith.constant 0 : index
    %c0_16 = arith.constant 0 : index
    %8 = vector.load %arg10[%c0_15, %c0_16] : memref<32x512xf32, #tpu.memory_space<vmem>>, vector<32x512xf32>
    %c0_17 = arith.constant 0 : index
    %c0_18 = arith.constant 0 : index
    %c0_19 = arith.constant 0 : index
    %9 = vector.load %arg1[%c0_17, %c0_18, %c0_19] : memref<1x16x512xf32, #tpu.memory_space<vmem>>, vector<1x16x512xf32>
    %10 = vector.shape_cast %9 : vector<1x16x512xf32> to vector<16x512xf32>
    %cst = arith.constant dense<0.000000e+00> : vector<16x44xf32>
    %11 = tpu.matmul %10, %0, %cst {dimension_numbers = #tpu.dot_dimension_numbers<[1], [0], [0], [1], [0, 0, 1, 1], [], []>} : vector<16x512xf32>, vector<512x44xf32>, vector<16x44xf32> -> vector<16x44xf32>
    %cst_20 = arith.constant dense<0.000000e+00> : vector<16x44xf32>
    %12 = tpu.matmul %10, %1, %cst_20 {dimension_numbers = #tpu.dot_dimension_numbers<[1], [0], [0], [1], [0, 0, 1, 1], [], []>} : vector<16x512xf32>, vector<512x44xf32>, vector<16x44xf32> -> vector<16x44xf32>
    %13 = vector.extract_strided_slice %2 {offsets = [0, 0], sizes = [16, 1], strides = [1, 1]} : vector<16x14xf32> to vector<16x1xf32>
    %14 = vector.extract_strided_slice %11 {offsets = [0, 0], sizes = [16, 16], strides = [1, 1]} : vector<16x44xf32> to vector<16x16xf32>
    %15 = vector.broadcast %13 : vector<16x1xf32> to vector<16x16xf32>
    %16 = arith.mulf %15, %14 : vector<16x16xf32>
    %17 = vector.extract_strided_slice %2 {offsets = [0, 1], sizes = [16, 1], strides = [1, 1]} : vector<16x14xf32> to vector<16x1xf32>
    %18 = vector.extract_strided_slice %11 {offsets = [0, 1], sizes = [16, 16], strides = [1, 1]} : vector<16x44xf32> to vector<16x16xf32>
    %19 = vector.broadcast %17 : vector<16x1xf32> to vector<16x16xf32>
    %20 = arith.mulf %19, %18 : vector<16x16xf32>
    %21 = arith.addf %16, %20 : vector<16x16xf32>
    %22 = vector.extract_strided_slice %2 {offsets = [0, 2], sizes = [16, 1], strides = [1, 1]} : vector<16x14xf32> to vector<16x1xf32>
    %23 = vector.extract_strided_slice %11 {offsets = [0, 2], sizes = [16, 16], strides = [1, 1]} : vector<16x44xf32> to vector<16x16xf32>
    %24 = vector.broadcast %22 : vector<16x1xf32> to vector<16x16xf32>
    %25 = arith.mulf %24, %23 : vector<16x16xf32>
    %26 = arith.addf %21, %25 : vector<16x16xf32>
    %27 = vector.extract_strided_slice %2 {offsets = [0, 3], sizes = [16, 1], strides = [1, 1]} : vector<16x14xf32> to vector<16x1xf32>
    %28 = vector.extract_strided_slice %11 {offsets = [0, 3], sizes = [16, 16], strides = [1, 1]} : vector<16x44xf32> to vector<16x16xf32>
    %29 = vector.broadcast %27 : vector<16x1xf32> to vector<16x16xf32>
    %30 = arith.mulf %29, %28 : vector<16x16xf32>
    %31 = arith.addf %26, %30 : vector<16x16xf32>
    %32 = vector.extract_strided_slice %2 {offsets = [0, 4], sizes = [16, 1], strides = [1, 1]} : vector<16x14xf32> to vector<16x1xf32>
    %33 = vector.extract_strided_slice %11 {offsets = [0, 4], sizes = [16, 16], strides = [1, 1]} : vector<16x44xf32> to vector<16x16xf32>
    %34 = vector.broadcast %32 : vector<16x1xf32> to vector<16x16xf32>
    %35 = arith.mulf %34, %33 : vector<16x16xf32>
    %36 = arith.addf %31, %35 : vector<16x16xf32>
    %37 = vector.extract_strided_slice %2 {offsets = [0, 5], sizes = [16, 1], strides = [1, 1]} : vector<16x14xf32> to vector<16x1xf32>
    %38 = vector.extract_strided_slice %11 {offsets = [0, 5], sizes = [16, 16], strides = [1, 1]} : vector<16x44xf32> to vector<16x16xf32>
    %39 = vector.broadcast %37 : vector<16x1xf32> to vector<16x16xf32>
    %40 = arith.mulf %39, %38 : vector<16x16xf32>
    %41 = arith.addf %36, %40 : vector<16x16xf32>
    %42 = vector.extract_strided_slice %2 {offsets = [0, 6], sizes = [16, 1], strides = [1, 1]} : vector<16x14xf32> to vector<16x1xf32>
    %43 = vector.extract_strided_slice %11 {offsets = [0, 6], sizes = [16, 16], strides = [1, 1]} : vector<16x44xf32> to vector<16x16xf32>
    %44 = vector.broadcast %42 : vector<16x1xf32> to vector<16x16xf32>
    %45 = arith.mulf %44, %43 : vector<16x16xf32>
    %46 = arith.addf %41, %45 : vector<16x16xf32>
    %47 = vector.extract_strided_slice %2 {offsets = [0, 7], sizes = [16, 1], strides = [1, 1]} : vector<16x14xf32> to vector<16x1xf32>
    %48 = vector.extract_strided_slice %11 {offsets = [0, 22], sizes = [16, 16], strides = [1, 1]} : vector<16x44xf32> to vector<16x16xf32>
    %49 = vector.broadcast %47 : vector<16x1xf32> to vector<16x16xf32>
    %50 = arith.mulf %49, %48 : vector<16x16xf32>
    %51 = vector.extract_strided_slice %2 {offsets = [0, 8], sizes = [16, 1], strides = [1, 1]} : vector<16x14xf32> to vector<16x1xf32>
    %52 = vector.extract_strided_slice %11 {offsets = [0, 23], sizes = [16, 16], strides = [1, 1]} : vector<16x44xf32> to vector<16x16xf32>
    %53 = vector.broadcast %51 : vector<16x1xf32> to vector<16x16xf32>
    %54 = arith.mulf %53, %52 : vector<16x16xf32>
    %55 = arith.addf %50, %54 : vector<16x16xf32>
    %56 = vector.extract_strided_slice %2 {offsets = [0, 9], sizes = [16, 1], strides = [1, 1]} : vector<16x14xf32> to vector<16x1xf32>
    %57 = vector.extract_strided_slice %11 {offsets = [0, 24], sizes = [16, 16], strides = [1, 1]} : vector<16x44xf32> to vector<16x16xf32>
    %58 = vector.broadcast %56 : vector<16x1xf32> to vector<16x16xf32>
    %59 = arith.mulf %58, %57 : vector<16x16xf32>
    %60 = arith.addf %55, %59 : vector<16x16xf32>
    %61 = vector.extract_strided_slice %2 {offsets = [0, 10], sizes = [16, 1], strides = [1, 1]} : vector<16x14xf32> to vector<16x1xf32>
    %62 = vector.extract_strided_slice %11 {offsets = [0, 25], sizes = [16, 16], strides = [1, 1]} : vector<16x44xf32> to vector<16x16xf32>
    %63 = vector.broadcast %61 : vector<16x1xf32> to vector<16x16xf32>
    %64 = arith.mulf %63, %62 : vector<16x16xf32>
    %65 = arith.addf %60, %64 : vector<16x16xf32>
    %66 = vector.extract_strided_slice %2 {offsets = [0, 11], sizes = [16, 1], strides = [1, 1]} : vector<16x14xf32> to vector<16x1xf32>
    %67 = vector.extract_strided_slice %11 {offsets = [0, 26], sizes = [16, 16], strides = [1, 1]} : vector<16x44xf32> to vector<16x16xf32>
    %68 = vector.broadcast %66 : vector<16x1xf32> to vector<16x16xf32>
    %69 = arith.mulf %68, %67 : vector<16x16xf32>
    %70 = arith.addf %65, %69 : vector<16x16xf32>
    %71 = vector.extract_strided_slice %2 {offsets = [0, 12], sizes = [16, 1], strides = [1, 1]} : vector<16x14xf32> to vector<16x1xf32>
    %72 = vector.extract_strided_slice %11 {offsets = [0, 27], sizes = [16, 16], strides = [1, 1]} : vector<16x44xf32> to vector<16x16xf32>
    %73 = vector.broadcast %71 : vector<16x1xf32> to vector<16x16xf32>
    %74 = arith.mulf %73, %72 : vector<16x16xf32>
    %75 = arith.addf %70, %74 : vector<16x16xf32>
    %76 = vector.extract_strided_slice %2 {offsets = [0, 13], sizes = [16, 1], strides = [1, 1]} : vector<16x14xf32> to vector<16x1xf32>
    %77 = vector.extract_strided_slice %11 {offsets = [0, 28], sizes = [16, 16], strides = [1, 1]} : vector<16x44xf32> to vector<16x16xf32>
    %78 = vector.broadcast %76 : vector<16x1xf32> to vector<16x16xf32>
    %79 = arith.mulf %78, %77 : vector<16x16xf32>
    %80 = arith.addf %75, %79 : vector<16x16xf32>
    %81 = tpu.concatenate %46, %80 in 1 : vector<16x16xf32>, vector<16x16xf32> -> vector<16x32xf32>
    %cst_21 = arith.constant dense<0.000000e+00> : vector<16xf32>
    %82 = vector.multi_reduction <add>, %81, %cst_21 [1] : vector<16x32xf32> to vector<16xf32>
    %83 = vector.shape_cast %82 : vector<16xf32> to vector<16x1xf32>
    %cst_22 = arith.constant 3.125000e-02 : f32
    %84 = vector.broadcast %cst_22 : f32 to vector<16x1xf32>
    %85 = arith.mulf %83, %84 : vector<16x1xf32>
    %86 = vector.broadcast %85 : vector<16x1xf32> to vector<16x32xf32>
    %87 = arith.subf %81, %86 : vector<16x32xf32>
    %88 = arith.mulf %87, %87 : vector<16x32xf32>
    %cst_23 = arith.constant dense<0.000000e+00> : vector<16xf32>
    %89 = vector.multi_reduction <add>, %88, %cst_23 [1] : vector<16x32xf32> to vector<16xf32>
    %90 = vector.shape_cast %89 : vector<16xf32> to vector<16x1xf32>
    %cst_24 = arith.constant 3.125000e-02 : f32
    %91 = vector.broadcast %cst_24 : f32 to vector<16x1xf32>
    %92 = arith.mulf %90, %91 : vector<16x1xf32>
    %cst_25 = arith.constant 9.99999974E-6 : f32
    %93 = vector.broadcast %cst_25 : f32 to vector<16x1xf32>
    %94 = arith.addf %92, %93 : vector<16x1xf32>
    %95 = math.rsqrt %94 : vector<16x1xf32>
    %96 = vector.broadcast %95 : vector<16x1xf32> to vector<16x32xf32>
    %97 = arith.mulf %87, %96 : vector<16x32xf32>
    %98 = arith.mulf %97, %3 : vector<16x32xf32>
    %99 = arith.addf %98, %4 : vector<16x32xf32>
    %100 = arith.negf %99 : vector<16x32xf32>
    %101 = math.exp %100 : vector<16x32xf32>
    %cst_26 = arith.constant 1.000000e+00 : f32
    %102 = vector.broadcast %cst_26 : f32 to vector<16x32xf32>
    %103 = arith.addf %102, %101 : vector<16x32xf32>
    %104 = arith.divf %102, %103 : vector<16x32xf32>
    %105 = vector.extract_strided_slice %2 {offsets = [0, 0], sizes = [16, 1], strides = [1, 1]} : vector<16x14xf32> to vector<16x1xf32>
    %106 = vector.extract_strided_slice %12 {offsets = [0, 0], sizes = [16, 16], strides = [1, 1]} : vector<16x44xf32> to vector<16x16xf32>
    %107 = vector.broadcast %105 : vector<16x1xf32> to vector<16x16xf32>
    %108 = arith.mulf %107, %106 : vector<16x16xf32>
    %109 = vector.extract_strided_slice %2 {offsets = [0, 1], sizes = [16, 1], strides = [1, 1]} : vector<16x14xf32> to vector<16x1xf32>
    %110 = vector.extract_strided_slice %12 {offsets = [0, 1], sizes = [16, 16], strides = [1, 1]} : vector<16x44xf32> to vector<16x16xf32>
    %111 = vector.broadcast %109 : vector<16x1xf32> to vector<16x16xf32>
    %112 = arith.mulf %111, %110 : vector<16x16xf32>
    %113 = arith.addf %108, %112 : vector<16x16xf32>
    %114 = vector.extract_strided_slice %2 {offsets = [0, 2], sizes = [16, 1], strides = [1, 1]} : vector<16x14xf32> to vector<16x1xf32>
    %115 = vector.extract_strided_slice %12 {offsets = [0, 2], sizes = [16, 16], strides = [1, 1]} : vector<16x44xf32> to vector<16x16xf32>
    %116 = vector.broadcast %114 : vector<16x1xf32> to vector<16x16xf32>
    %117 = arith.mulf %116, %115 : vector<16x16xf32>
    %118 = arith.addf %113, %117 : vector<16x16xf32>
    %119 = vector.extract_strided_slice %2 {offsets = [0, 3], sizes = [16, 1], strides = [1, 1]} : vector<16x14xf32> to vector<16x1xf32>
    %120 = vector.extract_strided_slice %12 {offsets = [0, 3], sizes = [16, 16], strides = [1, 1]} : vector<16x44xf32> to vector<16x16xf32>
    %121 = vector.broadcast %119 : vector<16x1xf32> to vector<16x16xf32>
    %122 = arith.mulf %121, %120 : vector<16x16xf32>
    %123 = arith.addf %118, %122 : vector<16x16xf32>
    %124 = vector.extract_strided_slice %2 {offsets = [0, 4], sizes = [16, 1], strides = [1, 1]} : vector<16x14xf32> to vector<16x1xf32>
    %125 = vector.extract_strided_slice %12 {offsets = [0, 4], sizes = [16, 16], strides = [1, 1]} : vector<16x44xf32> to vector<16x16xf32>
    %126 = vector.broadcast %124 : vector<16x1xf32> to vector<16x16xf32>
    %127 = arith.mulf %126, %125 : vector<16x16xf32>
    %128 = arith.addf %123, %127 : vector<16x16xf32>
    %129 = vector.extract_strided_slice %2 {offsets = [0, 5], sizes = [16, 1], strides = [1, 1]} : vector<16x14xf32> to vector<16x1xf32>
    %130 = vector.extract_strided_slice %12 {offsets = [0, 5], sizes = [16, 16], strides = [1, 1]} : vector<16x44xf32> to vector<16x16xf32>
    %131 = vector.broadcast %129 : vector<16x1xf32> to vector<16x16xf32>
    %132 = arith.mulf %131, %130 : vector<16x16xf32>
    %133 = arith.addf %128, %132 : vector<16x16xf32>
    %134 = vector.extract_strided_slice %2 {offsets = [0, 6], sizes = [16, 1], strides = [1, 1]} : vector<16x14xf32> to vector<16x1xf32>
    %135 = vector.extract_strided_slice %12 {offsets = [0, 6], sizes = [16, 16], strides = [1, 1]} : vector<16x44xf32> to vector<16x16xf32>
    %136 = vector.broadcast %134 : vector<16x1xf32> to vector<16x16xf32>
    %137 = arith.mulf %136, %135 : vector<16x16xf32>
    %138 = arith.addf %133, %137 : vector<16x16xf32>
    %139 = vector.extract_strided_slice %2 {offsets = [0, 7], sizes = [16, 1], strides = [1, 1]} : vector<16x14xf32> to vector<16x1xf32>
    %140 = vector.extract_strided_slice %12 {offsets = [0, 22], sizes = [16, 16], strides = [1, 1]} : vector<16x44xf32> to vector<16x16xf32>
    %141 = vector.broadcast %139 : vector<16x1xf32> to vector<16x16xf32>
    %142 = arith.mulf %141, %140 : vector<16x16xf32>
    %143 = vector.extract_strided_slice %2 {offsets = [0, 8], sizes = [16, 1], strides = [1, 1]} : vector<16x14xf32> to vector<16x1xf32>
    %144 = vector.extract_strided_slice %12 {offsets = [0, 23], sizes = [16, 16], strides = [1, 1]} : vector<16x44xf32> to vector<16x16xf32>
    %145 = vector.broadcast %143 : vector<16x1xf32> to vector<16x16xf32>
    %146 = arith.mulf %145, %144 : vector<16x16xf32>
    %147 = arith.addf %142, %146 : vector<16x16xf32>
    %148 = vector.extract_strided_slice %2 {offsets = [0, 9], sizes = [16, 1], strides = [1, 1]} : vector<16x14xf32> to vector<16x1xf32>
    %149 = vector.extract_strided_slice %12 {offsets = [0, 24], sizes = [16, 16], strides = [1, 1]} : vector<16x44xf32> to vector<16x16xf32>
    %150 = vector.broadcast %148 : vector<16x1xf32> to vector<16x16xf32>
    %151 = arith.mulf %150, %149 : vector<16x16xf32>
    %152 = arith.addf %147, %151 : vector<16x16xf32>
    %153 = vector.extract_strided_slice %2 {offsets = [0, 10], sizes = [16, 1], strides = [1, 1]} : vector<16x14xf32> to vector<16x1xf32>
    %154 = vector.extract_strided_slice %12 {offsets = [0, 25], sizes = [16, 16], strides = [1, 1]} : vector<16x44xf32> to vector<16x16xf32>
    %155 = vector.broadcast %153 : vector<16x1xf32> to vector<16x16xf32>
    %156 = arith.mulf %155, %154 : vector<16x16xf32>
    %157 = arith.addf %152, %156 : vector<16x16xf32>
    %158 = vector.extract_strided_slice %2 {offsets = [0, 11], sizes = [16, 1], strides = [1, 1]} : vector<16x14xf32> to vector<16x1xf32>
    %159 = vector.extract_strided_slice %12 {offsets = [0, 26], sizes = [16, 16], strides = [1, 1]} : vector<16x44xf32> to vector<16x16xf32>
    %160 = vector.broadcast %158 : vector<16x1xf32> to vector<16x16xf32>
    %161 = arith.mulf %160, %159 : vector<16x16xf32>
    %162 = arith.addf %157, %161 : vector<16x16xf32>
    %163 = vector.extract_strided_slice %2 {offsets = [0, 12], sizes = [16, 1], strides = [1, 1]} : vector<16x14xf32> to vector<16x1xf32>
    %164 = vector.extract_strided_slice %12 {offsets = [0, 27], sizes = [16, 16], strides = [1, 1]} : vector<16x44xf32> to vector<16x16xf32>
    %165 = vector.broadcast %163 : vector<16x1xf32> to vector<16x16xf32>
    %166 = arith.mulf %165, %164 : vector<16x16xf32>
    %167 = arith.addf %162, %166 : vector<16x16xf32>
    %168 = vector.extract_strided_slice %2 {offsets = [0, 13], sizes = [16, 1], strides = [1, 1]} : vector<16x14xf32> to vector<16x1xf32>
    %169 = vector.extract_strided_slice %12 {offsets = [0, 28], sizes = [16, 16], strides = [1, 1]} : vector<16x44xf32> to vector<16x16xf32>
    %170 = vector.broadcast %168 : vector<16x1xf32> to vector<16x16xf32>
    %171 = arith.mulf %170, %169 : vector<16x16xf32>
    %172 = arith.addf %167, %171 : vector<16x16xf32>
    %173 = tpu.concatenate %138, %172 in 1 : vector<16x16xf32>, vector<16x16xf32> -> vector<16x32xf32>
    %cst_27 = arith.constant dense<0.000000e+00> : vector<16xf32>
    %174 = vector.multi_reduction <add>, %173, %cst_27 [1] : vector<16x32xf32> to vector<16xf32>
    %175 = vector.shape_cast %174 : vector<16xf32> to vector<16x1xf32>
    %cst_28 = arith.constant 3.125000e-02 : f32
    %176 = vector.broadcast %cst_28 : f32 to vector<16x1xf32>
    %177 = arith.mulf %175, %176 : vector<16x1xf32>
    %178 = vector.broadcast %177 : vector<16x1xf32> to vector<16x32xf32>
    %179 = arith.subf %173, %178 : vector<16x32xf32>
    %180 = arith.mulf %179, %179 : vector<16x32xf32>
    %cst_29 = arith.constant dense<0.000000e+00> : vector<16xf32>
    %181 = vector.multi_reduction <add>, %180, %cst_29 [1] : vector<16x32xf32> to vector<16xf32>
    %182 = vector.shape_cast %181 : vector<16xf32> to vector<16x1xf32>
    %cst_30 = arith.constant 3.125000e-02 : f32
    %183 = vector.broadcast %cst_30 : f32 to vector<16x1xf32>
    %184 = arith.mulf %182, %183 : vector<16x1xf32>
    %cst_31 = arith.constant 9.99999974E-6 : f32
    %185 = vector.broadcast %cst_31 : f32 to vector<16x1xf32>
    %186 = arith.addf %184, %185 : vector<16x1xf32>
    %187 = math.rsqrt %186 : vector<16x1xf32>
    %188 = vector.broadcast %187 : vector<16x1xf32> to vector<16x32xf32>
    %189 = arith.mulf %179, %188 : vector<16x32xf32>
    %190 = arith.mulf %189, %5 : vector<16x32xf32>
    %191 = arith.addf %190, %6 : vector<16x32xf32>
    %192 = arith.negf %191 : vector<16x32xf32>
    %193 = math.exp %192 : vector<16x32xf32>
    %cst_32 = arith.constant 1.000000e+00 : f32
    %194 = vector.broadcast %cst_32 : f32 to vector<16x32xf32>
    %195 = arith.addf %194, %193 : vector<16x32xf32>
    %196 = arith.divf %194, %195 : vector<16x32xf32>
    %cst_33 = arith.constant dense<0.000000e+00> : vector<16x512xf32>
    %197 = tpu.matmul %104, %7, %cst_33 {dimension_numbers = #tpu.dot_dimension_numbers<[1], [0], [0], [1], [0, 0, 1, 1], [], []>} : vector<16x32xf32>, vector<32x512xf32>, vector<16x512xf32> -> vector<16x512xf32>
    %cst_34 = arith.constant dense<0.000000e+00> : vector<16x512xf32>
    %198 = tpu.matmul %196, %8, %cst_34 {dimension_numbers = #tpu.dot_dimension_numbers<[1], [0], [0], [1], [0, 0, 1, 1], [], []>} : vector<16x32xf32>, vector<32x512xf32>, vector<16x512xf32> -> vector<16x512xf32>
    %199 = arith.mulf %197, %198 : vector<16x512xf32>
    %200 = arith.mulf %10, %199 : vector<16x512xf32>
    %c0_35 = arith.constant 0 : index
    %c0_36 = arith.constant 0 : index
    %c0_37 = arith.constant 0 : index
    %201 = vector.load %arg11[%c0_35, %c0_36, %c0_37] : memref<1x16x512xf32, #tpu.memory_space<vmem>>, vector<1x16x512xf32>
    %202 = vector.shape_cast %201 : vector<1x16x512xf32> to vector<16x512xf32>
    %203 = vector.shape_cast %200 : vector<16x512xf32> to vector<1x16x512xf32>
    tpu.vector_store %arg11[%c0_35, %c0_36, %c0_37], %203 {strides = array<i32>} : memref<1x16x512xf32, #tpu.memory_space<vmem>>, vector<1x16x512xf32>,
    return
  }
  func.func @transform_0(%arg0: i32) -> (i32, i32, i32) {
    %c0_i32 = arith.constant 0 : i32
    %c0_i32_0 = arith.constant 0 : i32
    %c0_i32_1 = arith.constant 0 : i32
    return %arg0, %c0_i32, %c0_i32_0 : i32, i32, i32
  }
  func.func @transform_1(%arg0: i32) -> (i32, i32) {
    %c0_i32 = arith.constant 0 : i32
    %c0_i32_0 = arith.constant 0 : i32
    %c0_i32_1 = arith.constant 0 : i32
    return %c0_i32, %c0_i32_0 : i32, i32
  }
  func.func @transform_2(%arg0: i32) -> (i32, i32) {
    %c0_i32 = arith.constant 0 : i32
    %c0_i32_0 = arith.constant 0 : i32
    %c0_i32_1 = arith.constant 0 : i32
    return %c0_i32, %c0_i32_0 : i32, i32
  }
  func.func @transform_3(%arg0: i32) -> (i32, i32) {
    %c0_i32 = arith.constant 0 : i32
    %c0_i32_0 = arith.constant 0 : i32
    %c0_i32_1 = arith.constant 0 : i32
    return %c0_i32, %c0_i32_0 : i32, i32
  }
  func.func @transform_4(%arg0: i32) -> (i32, i32) {
    %c0_i32 = arith.constant 0 : i32
    %c0_i32_0 = arith.constant 0 : i32
    %c0_i32_1 = arith.constant 0 : i32
    return %c0_i32, %c0_i32_0 : i32, i32
  }
  func.func @transform_5(%arg0: i32) -> (i32, i32) {
    %c0_i32 = arith.constant 0 : i32
    %c0_i32_0 = arith.constant 0 : i32
    %c0_i32_1 = arith.constant 0 : i32
    return %c0_i32, %c0_i32_0 : i32, i32
  }
  func.func @transform_6(%arg0: i32) -> (i32, i32) {
    %c0_i32 = arith.constant 0 : i32
    %c0_i32_0 = arith.constant 0 : i32
    %c0_i32_1 = arith.constant 0 : i32
    return %c0_i32, %c0_i32_0 : i32, i32
  }
  func.func @transform_7(%arg0: i32) -> (i32, i32) {
    %c0_i32 = arith.constant 0 : i32
    %c0_i32_0 = arith.constant 0 : i32
    %c0_i32_1 = arith.constant 0 : i32
    return %c0_i32, %c0_i32_0 : i32, i32
  }
  func.func @transform_8(%arg0: i32) -> (i32, i32) {
    %c0_i32 = arith.constant 0 : i32
    %c0_i32_0 = arith.constant 0 : i32
    %c0_i32_1 = arith.constant 0 : i32
    return %c0_i32, %c0_i32_0 : i32, i32
  }
  func.func @transform_9(%arg0: i32) -> (i32, i32) {
    %c0_i32 = arith.constant 0 : i32
    %c0_i32_0 = arith.constant 0 : i32
    %c0_i32_1 = arith.constant 0 : i32
    return %c0_i32, %c0_i32_0 : i32, i32
  }
  func.func @transform_10(%arg0: i32) -> (i32, i32, i32) {
    %c0_i32 = arith.constant 0 : i32
    %c0_i32_0 = arith.constant 0 : i32
    %c0_i32_1 = arith.constant 0 : i32
    return %arg0, %c0_i32, %c0_i32_0 : i32, i32, i32
  }
}

</mosaic_0001>

<bundles_post_ra>
// kernel: tpu_custom_call.1
= control target key start
LH: loop header
LB: loop body
LE: loop exit
PB: predicated region body
PF: predicated region fallthrough
CT: control target
= control target key end

     0   :  { %15 = vsyncpa [#allocation3], 0  ;;  %s3271_s0 = inlined_call_operand.vmem [shape: f32[2,16,512], index: 0, kind: input, shape index: {}]   ;;  %s3272_s1 = inlined_call_operand.vmem [shape: f32[512,44], index: 1, kind: input, shape index: {}]   ;;  %s3273_s2 = inlined_call_operand.vmem [shape: f32[512,44], index: 2, kind: input, shape index: {}]   ;;  %s3274_s3 = inlined_call_operand.vmem [shape: f32[16,14], index: 3, kind: input, shape index: {}]   ;;  %s3275_s4 = inlined_call_operand.vmem [shape: f32[16,32], index: 4, kind: input, shape index: {}]   ;;  %s3276_s5 = inlined_call_operand.vmem [shape: f32[16,32], index: 5, kind: input, shape index: {}]   ;;  %s3277_s6 = inlined_call_operand.vmem [shape: f32[16,32], index: 6, kind: input, shape index: {}]   ;;  %s3278_s7 = inlined_call_operand.vmem [shape: f32[16,32], index: 7, kind: input, shape index: {}]   ;;  %s3279_s8 = inlined_call_operand.vmem [shape: f32[32,512], index: 8, kind: input, shape index: {}]   ;;  %s3280_s9 = inlined_call_operand.vmem [shape: f32[32,512], index: 9, kind: input, shape index: {}]   ;;  %s3281_s10 = inlined_call_operand.hbm [shape: f32[2,16,512], index: 10, kind: output, shape index: {}]  }
   0x1   :  { %17 = vsyncpa [#allocation3 + $0x1], 0  ;;  %s2373_s13 = smov 0   ;;  %s2375_s14 = smov 0  }
   0x2   :  { %s2377_s15 = smov 0   ;;  %s2379_s16 = smov 0  }
   0x3 LB: > { %s2394_s17 = sadd.s32 4294967295, %s2292_s16   ;;  %s1772_s18 = sadd.s32 4294967294, %s2292_s16   ;;  %s2292_s16 = sphi %s2379_s16, %s3289_s16   ;;  %s2288_s15 = sphi %s2377_s15, %s3288_s15   ;;  %s2284_s14 = sphi %s2375_s14, %s3287_s14   ;;  %s2280_s13 = sphi %s2373_s13, %s3286_s13  }
   0x4   : > { %s2398_s19 = sadd.s32 1, %s2292_s16   ;;  %s245_s20 = sadd.s32 1, %s2288_s15 }
   0x5   : > { %s242_s21 = ssub.s32 %s2292_s16, %s2398_s19  ;;  %p255_p0 = scmp.ne.s32.totalorder %s2288_s15, %s2284_s14 }
   0x6   : > { %p243_p1 = scmp.eq.s32.totalorder %s242_s21, 0  ;;  %p256_p2 = scmp.eq.s32.totalorder %s2394_s17, 1 }
   0x7   : > { %p261_p3 = scmp.ne.s32.totalorder %s2284_s14, %s2280_s13  ;;  %p262_p4 = scmp.eq.s32.totalorder %s1772_s18, 1 }
   0x8   : > { %s2409_s22 = scalar_select %p243_p1, %s2288_s15, %s245_s20  }
   0x9   : > { %p2411_p5 = por %p256_p2, %p255_p0  ;;  %p2415_p6 = por %p262_p4, %p261_p3 }
   0xa   : > { %3282 = sst [smem:[#allocation5_spill]] %s2409_s22  ;;  %p1775_p7 = scmp.ge.s32.totalorder %s2292_s16, 1 }
   0xb   : > { %p315_p8 = scmp.lt.s32.totalorder %s2292_s16, 3 }
   0xd   : > { %p316_p9 = pnand %p1775_p7, %p315_p8 }
   0xe   : > { %v374_v0 = vld [vmem:[%s3272_s1 + $0x80] sm:$0xff] (!%p316_p9)  ;;  %v375_v1 = vld [vmem:[%s3272_s1 + $0x88] sm:$0xff] (!%p316_p9)  ;;  %v2294_v7 = vmov (!%p316_p9), 8   ;;  %v376_v12 = vld [vmem:[%s3272_s1 + $0x90] sm:$0xff] (!%p316_p9)  ;;  %p353_p10 = scmp.lt.s32.totalorder (!%p316_p9), %s2394_s17, 1  ;;  %s2308_s22 = smov (!%p316_p9), 126  }
   0xf   : > { %319 = sbr.rel (%p316_p9) target bundleno = 1128 (0x468), region = 60  ;;  %v406_v2 = vld [vmem:[%s3272_s1 + $0x180] sm:$0xff] (!%p316_p9)  ;;  %v1950_v3 = vpack.c.bf16 (!%p316_p9), %v375_v1, %v374_v0  ;;  %v407_v4 = vld [vmem:[%s3272_s1 + $0x188] sm:$0xff] (!%p316_p9)  ;;  %2174 = vset.pattern.permute.xlu1 (!%p316_p9), %v2294_v7  ;;  %2172 = vset.pattern.permute.xlu0 (!%p316_p9), %v2294_v7  ;;  %v377_v14 = vld [vmem:[%s3272_s1 + $0x98] sm:$0xff] (!%p316_p9)  ;;  %s2309_s25 = smov (!%p316_p9), 127   ;;  %vm1106_vm0 = vcmask (!%p316_p9), 130048  }
  0x10   : > { %v358_v5 = vld [vmem:[%s3272_s1] sm:$0xff] (!%p316_p9)  ;;  %v359_v6 = vld [vmem:[%s3272_s1 + $0x8] sm:$0xff] (!%p316_p9)  ;;  %v1982_v8 = vpack.c.bf16 (!%p316_p9), %v407_v4, %v406_v2  ;;  %v408_v15 = vld [vmem:[%s3272_s1 + $0x190] sm:$0xff] (!%p316_p9)  ;;  %v1954_v17 = vpack.c.bf16 (!%p316_p9), %v377_v14, %v376_v12  ;;  %s2311_s26 = smov (!%p316_p9), 124   ;;  %s2312_s27 = smov (!%p316_p9), 122   ;;  %vm1109_vm1 = vcmask (!%p316_p9), 261120  }
  0x11   : > { %v1952_v9 = vpack.c.bf16 (!%p316_p9), %v359_v6, %v358_v5  ;;  %v390_v10 = vld [vmem:[%s3272_s1 + $0x100] sm:$0xff] (!%p316_p9)  ;;  %v391_v11 = vld [vmem:[%s3272_s1 + $0x108] sm:$0xff] (!%p316_p9)  ;;  %1951 = vmatprep.subr.bf16.mxu0 (!%p316_p9), %v1950_v3  ;;  %v409_v16 = vld [vmem:[%s3272_s1 + $0x198] sm:$0xff] (!%p316_p9)  ;;  %s2313_s29 = smov (!%p316_p9), 123   ;;  %s350_s18 = sand.u32 (!%p316_p9), 1, %s2284_s14  }
  0x12   : > { %v1984_v13 = vpack.c.bf16 (!%p316_p9), %v391_v11, %v390_v10  ;;  %1983 = vmatprep.subr.bf16.mxu1 (!%p316_p9), %v1982_v8  ;;  %v1986_v18 = vpack.c.bf16 (!%p316_p9), %v409_v16, %v408_v15  ;;  %v360_v19 = vld [vmem:[%s3272_s1 + $0x10] sm:$0xff] (!%p316_p9)  ;;  %v361_v20 = vld [vmem:[%s3272_s1 + $0x18] sm:$0xff] (!%p316_p9)  ;;  %v378_v24 = vld [vmem:[%s3272_s1 + $0xa0] sm:$0xff] (!%p316_p9)  ;;  %s1776_s20 = sshll.u32 (!%p316_p9), %s350_s18, 6 }
  0x13   : > { %1953 = vmatpush3.bf16.msra.mxu0 (!%p316_p9), %v1952_v9  ;;  %v392_v21 = vld [vmem:[%s3272_s1 + $0x110] sm:$0xff] (!%p316_p9)  ;;  %v1956_v22 = vpack.c.bf16 (!%p316_p9), %v361_v20, %v360_v19  ;;  %v393_v23 = vld [vmem:[%s3272_s1 + $0x118] sm:$0xff] (!%p316_p9)  ;;  %v379_v25 = vld [vmem:[%s3272_s1 + $0xa8] sm:$0xff] (!%p316_p9) }
  0x14   : > { %1985 = vmatpush3.bf16.msra.mxu1 (!%p316_p9), %v1984_v13  ;;  %1955 = vmatprep.subr.bf16.mxu0 (!%p316_p9), %v1954_v17  ;;  %v1988_v26 = vpack.c.bf16 (!%p316_p9), %v393_v23, %v392_v21  ;;  %v1958_v27 = vpack.c.bf16 (!%p316_p9), %v379_v25, %v378_v24  ;;  %v410_v28 = vld [vmem:[%s3272_s1 + $0x1a0] sm:$0xff] (!%p316_p9)  ;;  %v411_v29 = vld [vmem:[%s3272_s1 + $0x1a8] sm:$0xff] (!%p316_p9)  ;;  %v380_v36 = vld [vmem:[%s3272_s1 + $0xb0] sm:$0xff] (!%p316_p9) }
  0x15   : > { %1987 = vmatprep.subr.bf16.mxu1 (!%p316_p9), %v1986_v18  ;;  %v362_v30 = vld [vmem:[%s3272_s1 + $0x20] sm:$0xff] (!%p316_p9)  ;;  %v1990_v31 = vpack.c.bf16 (!%p316_p9), %v411_v29, %v410_v28  ;;  %v363_v32 = vld [vmem:[%s3272_s1 + $0x28] sm:$0xff] (!%p316_p9)  ;;  %v381_v37 = vld [vmem:[%s3272_s1 + $0xb8] sm:$0xff] (!%p316_p9) }
  0x16   : > { %v394_v33 = vld [vmem:[%s3272_s1 + $0x120] sm:$0xff]  ;;  %v395_v34 = vld [vmem:[%s3272_s1 + $0x128] sm:$0xff]  ;;  %v1960_v35 = vpack.c.bf16 %v363_v32, %v362_v30  ;;  %v412_v38 = vld [vmem:[%s3272_s1 + $0x1b0] sm:$0xff]  ;;  %v1962_v40 = vpack.c.bf16 %v381_v37, %v380_v36  ;;  %s2533_s30 = scalar_select %p353_p10, %s2394_s17, 1 }
  0x17   : > { %1957 = vmatpush3.bf16.msra.mxu0 %v1956_v22  ;;  %v1992_v39 = vpack.c.bf16 %v395_v34, %v394_v33  ;;  %v413_v41 = vld [vmem:[%s3272_s1 + $0x1b8] sm:$0xff]  ;;  %v364_v42 = vld [vmem:[%s3272_s1 + $0x30] sm:$0xff]  ;;  %v382_v47 = vld [vmem:[%s3272_s1 + $0xc0] sm:$0xff] }
  0x18   : > { %1989 = vmatpush3.bf16.msra.mxu1 %v1988_v26  ;;  %1959 = vmatprep.subr.bf16.mxu0 %v1958_v27  ;;  %v365_v43 = vld [vmem:[%s3272_s1 + $0x38] sm:$0xff]  ;;  %v1994_v44 = vpack.c.bf16 %v413_v41, %v412_v38  ;;  %v396_v45 = vld [vmem:[%s3272_s1 + $0x130] sm:$0xff]  ;;  %v383_v48 = vld [vmem:[%s3272_s1 + $0xc8] sm:$0xff]  ;;  %s1796_s21 = sshll.u32 %s2533_s30, 6  ;;  %s2315_s30 = smov [#allocation2]  }
  0x19   : > { %1991 = vmatprep.subr.bf16.mxu1 %v1990_v31  ;;  %v397_v46 = vld [vmem:[%s3272_s1 + $0x138] sm:$0xff]  ;;  %v414_v49 = vld [vmem:[%s3272_s1 + $0x1c0] sm:$0xff]  ;;  %v415_v50 = vld [vmem:[%s3272_s1 + $0x1c8] sm:$0xff]  ;;  %v1964_v51 = vpack.c.bf16 %v365_v43, %v364_v42  ;;  %v1966_v53 = vpack.c.bf16 %v383_v48, %v382_v47  ;;  %s2581_s28 = scalar_lea.vmem %s3271_s0, %s1796_s21  ;;  %s2310_s21 = smov 125  }
  0x1a   : > { %v1996_v52 = vpack.c.bf16 %v397_v46, %v396_v45  ;;  %v366_v54 = vld [vmem:[%s3272_s1 + $0x40] sm:$0xff]  ;;  %v367_v55 = vld [vmem:[%s3272_s1 + $0x48] sm:$0xff]  ;;  %v1998_v57 = vpack.c.bf16 %v415_v50, %v414_v49  ;;  %v384_v59 = vld [vmem:[%s3272_s1 + $0xd0] sm:$0xff]  ;;  %s2234_s12 = sshll.u32 %s2315_s30, 4  ;;  %s2235_s12 = int_to_ptr.vmem [resolvable:$false] %s2234_s12 }
  0x1b   : > { %1961 = vmatpush3.bf16.msra.mxu0 %v1960_v35  ;;  %v398_v56 = vld [vmem:[%s3272_s1 + $0x140] sm:$0xff]  ;;  %v399_v58 = vld [vmem:[%s3272_s1 + $0x148] sm:$0xff]  ;;  %v385_v60 = vld [vmem:[%s3272_s1 + $0xd8] sm:$0xff]  ;;  %v1968_v63 = vpack.c.bf16 %v367_v55, %v366_v54 }
  0x1c   : > { %1993 = vmatpush3.bf16.msra.mxu1 %v1992_v39  ;;  %1963 = vmatprep.subr.bf16.mxu0 %v1962_v40  ;;  %v416_v61 = vld [vmem:[%s3272_s1 + $0x1d0] sm:$0xff]  ;;  %v417_v62 = vld [vmem:[%s3272_s1 + $0x1d8] sm:$0xff]  ;;  %v2000_v0 = vpack.c.bf16 %v399_v58, %v398_v56  ;;  %v1970_v1 = vpack.c.bf16 %v385_v60, %v384_v59  ;;  %v386_v7 = vld [vmem:[%s3272_s1 + $0xe0] sm:$0xff] }
  0x1d   : > { %1995 = vmatprep.subr.bf16.mxu1 %v1994_v44  ;;  %v368_v2 = vld [vmem:[%s3272_s1 + $0x50] sm:$0xff]  ;;  %v369_v3 = vld [vmem:[%s3272_s1 + $0x58] sm:$0xff]  ;;  %v2002_v5 = vpack.c.bf16 %v417_v62, %v416_v61  ;;  %v387_v8 = vld [vmem:[%s3272_s1 + $0xe8] sm:$0xff] }
  0x1e   : > { %v400_v4 = vld [vmem:[%s3272_s1 + $0x150] sm:$0xff]  ;;  %v401_v6 = vld [vmem:[%s3272_s1 + $0x158] sm:$0xff]  ;;  %v418_v9 = vld [vmem:[%s3272_s1 + $0x1e0] sm:$0xff]  ;;  %v1972_v11 = vpack.c.bf16 %v369_v3, %v368_v2  ;;  %v1974_v15 = vpack.c.bf16 %v387_v8, %v386_v7 }
  0x1f   : > { %1965 = vmatpush3.bf16.msra.mxu0 %v1964_v51  ;;  %v419_v10 = vld [vmem:[%s3272_s1 + $0x1e8] sm:$0xff]  ;;  %v370_v12 = vld [vmem:[%s3272_s1 + $0x60] sm:$0xff]  ;;  %v2004_v14 = vpack.c.bf16 %v401_v6, %v400_v4  ;;  %v2602_v18 = vld [vmem:[%s2581_s28 + $0x18] sm:$0xff] }
  0x20   : > { %1997 = vmatpush3.bf16.msra.mxu1 %v1996_v52  ;;  %1967 = vmatprep.subr.bf16.mxu0 %v1966_v53  ;;  %v371_v13 = vld [vmem:[%s3272_s1 + $0x68] sm:$0xff]  ;;  %v402_v16 = vld [vmem:[%s3272_s1 + $0x160] sm:$0xff]  ;;  %v2006_v19 = vpack.c.bf16 %v419_v10, %v418_v9  ;;  %v388_v21 = vld [vmem:[%s3272_s1 + $0xf0] sm:$0xff] }
  0x21   : > { %1999 = vmatprep.subr.bf16.mxu1 %v1998_v57  ;;  %v2599_v17 = vld [vmem:[%s2581_s28 + $0x8] sm:$0xff]  ;;  %v389_v22 = vld [vmem:[%s3272_s1 + $0xf8] sm:$0xff]  ;;  %v420_v23 = vld [vmem:[%s3272_s1 + $0x1f0] sm:$0xff]  ;;  %675 = vmatprep.mubr.f32.mxu1 %v2602_v18  ;;  %v1976_v25 = vpack.c.bf16 %v371_v13, %v370_v12 }
  0x22   : > { %v403_v20 = vld [vmem:[%s3272_s1 + $0x168] sm:$0xff]  ;;  %600 = vmatprep.mubr.f32.mxu0 %v2599_v17  ;;  %v421_v24 = vld [vmem:[%s3272_s1 + $0x1f8] sm:$0xff]  ;;  %v1978_v27 = vpack.c.bf16 %v389_v22, %v388_v21  ;;  %v372_v28 = vld [vmem:[%s3272_s1 + $0x70] sm:$0xff] }
  0x23   : > { %1969 = vmatpush3.bf16.msra.mxu0 %v1968_v63  ;;  %v2008_v26 = vpack.c.bf16 %v403_v20, %v402_v16  ;;  %v373_v29 = vld [vmem:[%s3272_s1 + $0x78] sm:$0xff]  ;;  %v404_v30 = vld [vmem:[%s3272_s1 + $0x170] sm:$0xff]  ;;  %v2010_v31 = vpack.c.bf16 %v421_v24, %v420_v23  ;;  %v438_v33 = vld [vmem:[%s3273_s2 + $0x80] sm:$0xff] }
  0x24   : > { %2001 = vmatpush3.bf16.msra.mxu1 %v2000_v0  ;;  %1971 = vmatprep.subr.bf16.mxu0 %v1970_v1  ;;  %v405_v32 = vld [vmem:[%s3272_s1 + $0x178] sm:$0xff]  ;;  %v439_v34 = vld [vmem:[%s3273_s2 + $0x88] sm:$0xff]  ;;  %v470_v35 = vld [vmem:[%s3273_s2 + $0x180] sm:$0xff]  ;;  %v1980_v37 = vpack.c.bf16 %v373_v29, %v372_v28 }
  0x25   : > { %2003 = vmatprep.subr.bf16.mxu1 %v2002_v5  ;;  %v471_v36 = vld [vmem:[%s3273_s2 + $0x188] sm:$0xff]  ;;  %v2012_v38 = vpack.c.bf16 %v405_v32, %v404_v30  ;;  %v2014_v39 = vpack.c.bf16 %v439_v34, %v438_v33  ;;  %v422_v40 = vld [vmem:[%s3273_s2] sm:$0xff]  ;;  %v2661_v46 = vld [vmem:[%s2581_s28 + $0x10] sm:$0xff] }
  0x26   : > { %v423_v41 = vld [vmem:[%s3273_s2 + $0x8] sm:$0xff]  ;;  %v2652_v42 = vld [vmem:[%s2581_s28] sm:$0xff]  ;;  %v2046_v43 = vpack.c.bf16 %v471_v36, %v470_v35  ;;  %v440_v47 = vld [vmem:[%s3273_s2 + $0x90] sm:$0xff] }
  0x27   : > { %1973 = vmatpush3.bf16.msra.mxu0 %v1972_v11  ;;  %v454_v44 = vld [vmem:[%s3273_s2 + $0x100] sm:$0xff]  ;;  %v455_v45 = vld [vmem:[%s3273_s2 + $0x108] sm:$0xff]  ;;  %v441_v48 = vld [vmem:[%s3273_s2 + $0x98] sm:$0xff]  ;;  %v2016_v49 = vpack.c.bf16 %v423_v41, %v422_v40 }
  0x28   : > { %2005 = vmatpush3.bf16.msra.mxu1 %v2004_v14  ;;  %1975 = vmatprep.subr.bf16.mxu0 %v1974_v15  ;;  %v2670_v50 = vld [vmem:[%s2581_s28 + $0x28] sm:$0xff]  ;;  %v472_v51 = vld [vmem:[%s3273_s2 + $0x190] sm:$0xff]  ;;  %v473_v52 = vld [vmem:[%s3273_s2 + $0x198] sm:$0xff]  ;;  %v2048_v53 = vpack.c.bf16 %v455_v45, %v454_v44  ;;  %v2018_v57 = vpack.c.bf16 %v441_v48, %v440_v47 }
  0x29   : > { %2007 = vmatprep.subr.bf16.mxu1 %v2006_v19  ;;  %v424_v54 = vld [vmem:[%s3273_s2 + $0x10] sm:$0xff]  ;;  %v425_v55 = vld [vmem:[%s3273_s2 + $0x18] sm:$0xff]  ;;  %v442_v59 = vld [vmem:[%s3273_s2 + $0xa0] sm:$0xff]  ;;  %v2050_v62 = vpack.c.bf16 %v473_v52, %v472_v51 }
  0x2a   : > { %v456_v56 = vld [vmem:[%s3273_s2 + $0x110] sm:$0xff]  ;;  %v457_v58 = vld [vmem:[%s3273_s2 + $0x118] sm:$0xff]  ;;  %v443_v60 = vld [vmem:[%s3273_s2 + $0xa8] sm:$0xff]  ;;  %v2020_v3 = vpack.c.bf16 %v425_v55, %v424_v54 }
  0x2b   : > { %1977 = vmatpush3.bf16.msra.mxu0 %v1976_v25  ;;  %v2698_v61 = vld [vmem:[%s2581_s28 + $0x38] sm:$0xff]  ;;  %v474_v63 = vld [vmem:[%s3273_s2 + $0x1a0] sm:$0xff]  ;;  %v475_v0 = vld [vmem:[%s3273_s2 + $0x1a8] sm:$0xff]  ;;  %v2052_v4 = vpack.c.bf16 %v457_v58, %v456_v56  ;;  %v2022_v5 = vpack.c.bf16 %v443_v60, %v442_v59 }
  0x2c   : > { %2009 = vmatpush3.bf16.msra.mxu1 %v2008_v26  ;;  %1979 = vmatprep.subr.bf16.mxu0 %v1978_v27  ;;  %v2708_v1 = vld [vmem:[%s2581_s28 + $0x20] sm:$0xff]  ;;  %v2711_v2 = vld [vmem:[%s2581_s28 + $0x30] sm:$0xff]  ;;  %v427_v7 = vld [vmem:[%s3273_s2 + $0x28] sm:$0xff]  ;;  %v2054_v9 = vpack.c.bf16 %v475_v0, %v474_v63 }
  0x2d   : > { %2011 = vmatprep.subr.bf16.mxu1 %v2010_v31  ;;  %v426_v6 = vld [vmem:[%s3273_s2 + $0x20] sm:$0xff]  ;;  %v459_v10 = vld [vmem:[%s3273_s2 + $0x128] sm:$0xff]  ;;  %v444_v11 = vld [vmem:[%s3273_s2 + $0xb0] sm:$0xff] }
  0x2e   : > { %v458_v8 = vld [vmem:[%s3273_s2 + $0x120] sm:$0xff]  ;;  %v445_v12 = vld [vmem:[%s3273_s2 + $0xb8] sm:$0xff]  ;;  %v476_v13 = vld [vmem:[%s3273_s2 + $0x1b0] sm:$0xff]  ;;  %v2024_v15 = vpack.c.bf16 %v427_v7, %v426_v6 }
  0x2f   : > { %1981 = vmatpush3.bf16.msra.mxu0 %v1980_v37  ;;  %v477_v14 = vld [vmem:[%s3273_s2 + $0x1b8] sm:$0xff]  ;;  %v428_v16 = vld [vmem:[%s3273_s2 + $0x30] sm:$0xff]  ;;  %v2056_v19 = vpack.c.bf16 %v459_v10, %v458_v8  ;;  %v2026_v20 = vpack.c.bf16 %v445_v12, %v444_v11  ;;  %v2753_v23 = vld [vmem:[%s3274_s3 + $0x8] sm:$0xff] }
  0x30   : > { %2013 = vmatpush3.bf16.msra.mxu1 %v2012_v38  ;;  %2015 = vmatprep.subr.bf16.mxu0 %v2014_v39  ;;  %v429_v21 = vld [vmem:[%s3273_s2 + $0x38] sm:$0xff]  ;;  %v460_v22 = vld [vmem:[%s3273_s2 + $0x130] sm:$0xff]  ;;  %v2058_v24 = vpack.c.bf16 %v477_v14, %v476_v13  ;;  %v446_v26 = vld [vmem:[%s3273_s2 + $0xc0] sm:$0xff]  ;;  %v2295_v39 = vmov 10  }
  0x31   : > { %2047 = vmatprep.subr.bf16.mxu1 %v2046_v43  ;;  %v461_v25 = vld [vmem:[%s3273_s2 + $0x138] sm:$0xff]  ;;  %v447_v27 = vld [vmem:[%s3273_s2 + $0xc8] sm:$0xff]  ;;  %983 = vperm.xlu1 %2174, %v2753_v23   ;;  %v478_v28 = vld [vmem:[%s3273_s2 + $0x1c0] sm:$0xff]  ;;  %v2028_v30 = vpack.c.bf16 %v429_v21, %v428_v16 }
  0x32   : > { %601 = vmatmul.mubr.f32.vlgmr.msra.gmra.mrb[0].mxu0 %v2652_v42  ;;  %v479_v29 = vld [vmem:[%s3273_s2 + $0x1c8] sm:$0xff]  ;;  %v430_v31 = vld [vmem:[%s3273_s2 + $0x40] sm:$0xff]  ;;  %v2060_v32 = vpack.c.bf16 %v461_v25, %v460_v22  ;;  %v2030_v33 = vpack.c.bf16 %v447_v27, %v446_v26  ;;  %v448_v37 = vld [vmem:[%s3273_s2 + $0xd0] sm:$0xff]  ;;  %v2298_v22 = vmov 12   ;;  %v2306_v25 = vmov 5  }
  0x33   : > { %676 = vmatmul.mubr.f32.vlgmr.msra.gmra.mrb[0].mxu1 %v2661_v46  ;;  %2017 = vmatpush3.bf16.msra.mxu0 %v2016_v49  ;;  %v431_v34 = vld [vmem:[%s3273_s2 + $0x48] sm:$0xff]  ;;  %v2062_v35 = vpack.c.bf16 %v479_v29, %v478_v28  ;;  %v449_v38 = vld [vmem:[%s3273_s2 + $0xd8] sm:$0xff]  ;;  %v480_v40 = vld [vmem:[%s3273_s2 + $0x1d0] sm:$0xff]  ;;  %v2307_v26 = vmov 0  }
  0x34   : > { %2049 = vmatpush3.bf16.msra.mxu1 %v2048_v53  ;;  %605 = vmatprep.mubr.f32.mxu0 %v2670_v50  ;;  %v463_v36 = vld [vmem:[%s3273_s2 + $0x148] sm:$0xff]  ;;  %v481_v41 = vld [vmem:[%s3273_s2 + $0x1d8] sm:$0xff]  ;;  %v2032_v43 = vpack.c.bf16 %v431_v34, %v430_v31  ;;  %v2034_v45 = vpack.c.bf16 %v449_v38, %v448_v37  ;;  %v432_v47 = vld [vmem:[%s3273_s2 + $0x50] sm:$0xff] }
  0x35   : > { %680 = vmatprep.mubr.f32.mxu1 %v2698_v61  ;;  %2019 = vmatprep.subr.bf16.mxu0 %v2018_v57  ;;  %v433_v48 = vld [vmem:[%s3273_s2 + $0x58] sm:$0xff]  ;;  %v464_v49 = vld [vmem:[%s3273_s2 + $0x150] sm:$0xff]  ;;  %v2066_v51 = vpack.c.bf16 %v481_v41, %v480_v40  ;;  %v450_v53 = vld [vmem:[%s3273_s2 + $0xe0] sm:$0xff]  ;;  %v2296_v57 = vmov 9  }
  0x36   : > { %606 = vmatmul.mubr.f32.gmra.mrb[2].mxu0 %v2708_v1  ;;  %2051 = vmatprep.subr.bf16.mxu1 %v2050_v62  ;;  %v465_v52 = vld [vmem:[%s3273_s2 + $0x158] sm:$0xff]  ;;  %v451_v54 = vld [vmem:[%s3273_s2 + $0xe8] sm:$0xff]  ;;  %v482_v55 = vld [vmem:[%s3273_s2 + $0x1e0] sm:$0xff]  ;;  %v2036_v58 = vpack.c.bf16 %v433_v48, %v432_v47 }
  0x37   : > { %681 = vmatmul.mubr.f32.gmra.mrb[2].mxu1 %v2711_v2  ;;  %2021 = vmatpush3.bf16.msra.mxu0 %v2020_v3  ;;  %v483_v56 = vld [vmem:[%s3273_s2 + $0x1e8] sm:$0xff]  ;;  %v2068_v59 = vpack.c.bf16 %v465_v52, %v464_v49  ;;  %v2038_v60 = vpack.c.bf16 %v451_v54, %v450_v53  ;;  %v434_v62 = vld [vmem:[%s3273_s2 + $0x60] sm:$0xff]  ;;  %v453_v6 = vld [vmem:[%s3273_s2 + $0xf8] sm:$0xff] }
  0x38   : > { %2053 = vmatpush3.bf16.msra.mxu1 %v2052_v4  ;;  %2023 = vmatprep.subr.bf16.mxu0 %v2022_v5  ;;  %v435_v63 = vld [vmem:[%s3273_s2 + $0x68] sm:$0xff]  ;;  %v466_v0 = vld [vmem:[%s3273_s2 + $0x160] sm:$0xff]  ;;  %v2070_v3 = vpack.c.bf16 %v483_v56, %v482_v55  ;;  %v452_v5 = vld [vmem:[%s3273_s2 + $0xf0] sm:$0xff] }
  0x39   : > { %2055 = vmatprep.subr.bf16.mxu1 %v2054_v9  ;;  %750 = vmatprep.mubr.f32.mxu0 %v2599_v17  ;;  %v462_v17 = vld [vmem:[%s3273_s2 + $0x140] sm:$0xff]  ;;  %v467_v4 = vld [vmem:[%s3273_s2 + $0x168] sm:$0xff]  ;;  %v484_v7 = vld [vmem:[%s3273_s2 + $0x1f0] sm:$0xff]  ;;  %v2040_v9 = vpack.c.bf16 %v435_v63, %v434_v62  ;;  %v2042_v11 = vpack.c.bf16 %v453_v6, %v452_v5 }
  0x3a   : > { %825 = vmatprep.mubr.f32.mxu1 %v2602_v18  ;;  %v2785_v18 = vld [vmem:[%s3274_s3] sm:$0xff]  ;;  %2175 = vset.pattern.permute.xlu1 %v2295_v39  ;;  %v2064_v44 = vpack.c.bf16 %v463_v36, %v462_v17  ;;  %v485_v8 = vld [vmem:[%s3273_s2 + $0x1f8] sm:$0xff]  ;;  %v2072_v10 = vpack.c.bf16 %v467_v4, %v466_v0  ;;  %v436_v12 = vld [vmem:[%s3273_s2 + $0x70] sm:$0xff] }
  0x3b   : > { %2025 = vmatpush3.bf16.msra.mxu0 %v2024_v15  ;;  %1019 = vperm.xlu1 %2175, %v2785_v18   ;;  %v437_v13 = vld [vmem:[%s3273_s2 + $0x78] sm:$0xff]  ;;  %v2074_v14 = vpack.c.bf16 %v485_v8, %v484_v7  ;;  %v468_v15 = vld [vmem:[%s3273_s2 + $0x170] sm:$0xff] }
  0x3c   : > { %2057 = vmatpush3.bf16.msra.mxu1 %v2056_v19  ;;  %2027 = vmatprep.subr.bf16.mxu0 %v2026_v20  ;;  %v469_v16 = vld [vmem:[%s3273_s2 + $0x178] sm:$0xff]  ;;  %v2297_v19 = vmov 11   ;;  %v2044_v20 = vpack.c.bf16 %v437_v13, %v436_v12 }
  0x3d   : > { %2059 = vmatprep.subr.bf16.mxu1 %v2058_v24  ;;  %979 = vperm.xlu0 %2172, %v2785_v18   ;;  %v2076_v21 = vpack.c.bf16 %v469_v16, %v468_v15  ;;  %v2299_v24 = vmov 13  }
  0x3f   : > { %2029 = vmatpush3.bf16.msra.mxu0 %v2028_v30  ;;  %2176 = vset.pattern.permute.xlu1 %v2296_v57 }
  0x40   : > { %2061 = vmatpush3.bf16.msra.mxu1 %v2060_v32  ;;  %2031 = vmatprep.subr.bf16.mxu0 %v2030_v33 }
  0x41   : > { %2063 = vmatprep.subr.bf16.mxu1 %v2062_v35  ;;  %2173 = vset.pattern.permute.xlu0 %v2296_v57 }
  0x42   : > { %1003 = vperm.xlu1 %2176, %v2753_v23   ;;  %999 = vperm.xlu0 %2173, %v2785_v18  }
  0x43   : > { %2033 = vmatpush3.bf16.msra.mxu0 %v2032_v43 }
  0x44   : > { %2065 = vmatpush3.bf16.msra.mxu1 %v2064_v44  ;;  %2035 = vmatprep.subr.bf16.mxu0 %v2034_v45 }
  0x45   : > { %2067 = vmatprep.subr.bf16.mxu1 %v2066_v51 }
  0x46   : > { %2178 = vset.pattern.permute.xlu1 %v2295_v39  ;;  %2177 = vset.pattern.permute.xlu0 %v2297_v19 }
  0x47   : > { %2037 = vmatpush3.bf16.msra.mxu0 %v2036_v58  ;;  %1023 = vperm.xlu1 %2178, %v2753_v23  }
  0x48   : > { %2069 = vmatpush3.bf16.msra.mxu1 %v2068_v59  ;;  %2039 = vmatprep.subr.bf16.mxu0 %v2038_v60 }
  0x49   : > { %2071 = vmatprep.subr.bf16.mxu1 %v2070_v3  ;;  %1039 = vperm.xlu0 %2177, %v2785_v18  }
  0x4b   : > { %2041 = vmatpush3.bf16.msra.mxu0 %v2040_v9  ;;  %2179 = vset.pattern.permute.xlu1 %v2298_v22 }
  0x4c   : > { %2073 = vmatpush3.bf16.msra.mxu1 %v2072_v10  ;;  %2043 = vmatprep.subr.bf16.mxu0 %v2042_v11 }
  0x4d   : > { %2075 = vmatprep.subr.bf16.mxu1 %v2074_v14  ;;  %1059 = vperm.xlu1 %2179, %v2785_v18  }
  0x4e   : > { %1043 = vperm.xlu0 %2177, %v2753_v23  }
  0x4f   : > { %2045 = vmatpush3.bf16.msra.mxu0 %v2044_v20 }
  0x50   : > { %2077 = vmatpush3.bf16.msra.mxu1 %v2076_v21 }
  0x51   : > { %2180 = vset.pattern.permute.xlu1 %v2299_v24 }
  0x52   : > { %751 = vmatmul.mubr.f32.vlgmr.msra.gmra.mrb[4].mxu0 %v2652_v42  ;;  %1079 = vperm.xlu1 %2180, %v2785_v18   ;;  %v2300_v42 = vmov 7  }
  0x53   : > { %826 = vmatmul.mubr.f32.vlgmr.msra.gmra.mrb[4].mxu1 %v2661_v46  ;;  %755 = vmatprep.mubr.f32.mxu0 %v2670_v50  ;;  %v2301_v46 = vmov 1   ;;  %v2302_v50 = vmov 3  }
  0x54   : > { %830 = vmatprep.mubr.f32.mxu1 %v2698_v61  ;;  %2181 = vset.pattern.permute.xlu0 %v2298_v22  ;;  %v2303_v61 = vmov 2  }
  0x55   : > { %1063 = vperm.xlu0 %2181, %v2753_v23  }
  0x56   : > { %756 = vmatmul.mubr.f32.gmra.mrb[6].mxu0 %v2708_v1  ;;  %1083 = vperm.xlu1 %2180, %v2753_v23   ;;  %v2304_v1 = vmov 4  }
  0x57   : > { %831 = vmatmul.mubr.f32.gmra.mrb[6].mxu1 %v2711_v2  ;;  %v2305_v2 = vmov 6  }
  0x59   : > { %2183 = vset.pattern.permute.xlu0 %v2300_v42 }
  0x5a   : > { %969 = vperm.xlu0 %2183, %v2785_v18   ;;  %2182 = vset.pattern.permute.xlu1 %v2301_v46 }
  0x5b   : > { %849 = vperm.xlu1 %2182, %v2785_v18  }
  0x5e   : > { %2186 = vset.pattern.permute.xlu0 %v2302_v50 }
  0x5f   : > { %889 = vperm.xlu0 %2186, %v2785_v18   ;;  %2184 = vset.pattern.permute.xlu1 %v2303_v61 }
  0x60   : > { %869 = vperm.xlu1 %2184, %v2785_v18  }
  0x63   : > { %2189 = vset.pattern.permute.xlu0 %v2304_v1 }
  0x64   : > { %909 = vperm.xlu0 %2189, %v2785_v18   ;;  %2185 = vset.pattern.permute.xlu1 %v2301_v46 }
  0x65   : > { %853 = vperm.xlu1 %2185, %v2753_v23  }
  0x68   : > { %2193 = vset.pattern.permute.xlu0 %v2305_v2 }
  0x69   : > { %949 = vperm.xlu0 %2193, %v2785_v18   ;;  %2187 = vset.pattern.permute.xlu1 %v2300_v42 }
  0x6a   : > { %973 = vperm.xlu1 %2187, %v2753_v23  }
  0x6d   : > { %953 = vperm.xlu0 %2193, %v2753_v23  }
  0x6e   : > { %2188 = vset.pattern.permute.xlu1 %v2303_v61 }
  0x6f   : > { %873 = vperm.xlu1 %2188, %v2753_v23  }
  0x71   : > { %2196 = vset.pattern.permute.xlu0 %v2307_v26 }
  0x73   : > { %2190 = vset.pattern.permute.xlu1 %v2302_v50 }
  0x74   : > { %893 = vperm.xlu1 %2190, %v2753_v23  }
  0x78   : > { %2191 = vset.pattern.permute.xlu1 %v2306_v25 }
  0x79   : > { %929 = vperm.xlu1 %2191, %v2785_v18  }
  0x7d   : > { %2192 = vset.pattern.permute.xlu1 %v2304_v1 }
  0x7e   : > { %913 = vperm.xlu1 %2192, %v2753_v23  }
  0x82   : > { %2194 = vset.pattern.permute.xlu1 %v2306_v25 }
  0x83   : > { %933 = vperm.xlu1 %2194, %v2753_v23  }
  0x87   : > { %2195 = vset.pattern.permute.xlu1 %v2307_v26 }
  0xb0   : > { %v2894_v27 = vpop.permute.xlu1 %983 }
  0xba   : > { %v2896_v28 = vpop.permute.xlu1 %1019 }
  0xbc   : > { %v2900_v30 = vpop.permute.xlu0 %979 }
  0xc1   : > { %v2898_v29 = vpop.permute.xlu1 %1003  ;;  %v1000_v37 = vpop.permute.xlu0 %999 }
  0xc6   : > { %v2902_v34 = vpop.permute.xlu1 %1023 }
  0xc8   : > { %v1040_v52 = vpop.permute.xlu0 %1039 }
  0xcc   : > { %v1060_v48 = vpop.permute.xlu1 %1059 }
  0xcd   : > { %v1044_v58 = vpop.permute.xlu0 %1043 }
  0xd1   : > { %v1080_v55 = vpop.permute.xlu1 %1079 }
  0xd4   : > { %v1064_v63 = vpop.permute.xlu0 %1063 }
  0xd5   : > { %v1084_v4 = vpop.permute.xlu1 %1083 }
  0xda   : > { %v850_v16 = vpop.permute.xlu1 %849 }
  0xdf   : > { %v870_v1 = vpop.permute.xlu1 %869 }
  0xe4   : > { %v854_v26 = vpop.permute.xlu1 %853 }
 0x105   : > { %v1830_v31 = vpop.f32.mrb[0].mxu0 }
 0x106   : > { %v1868_v32 = vpop.f32.mrb[0].mxu1  ;;  %v1831_v33 = vpop.f32.mrb[1].mxu0 }
 0x107   : > { %v1832_v17 = vadd.f32 %v1831_v33, %v1830_v31  ;;  %v1869_v35 = vpop.f32.mrb[1].mxu1 }
 0x108   : > { %v1870_v36 = vadd.f32 %v1869_v35, %v1868_v32  ;;  %v2964_v32 = vpop.permute.xlu1 %973 }
 0x109   : > { %v1833_v38 = vpop.f32.mrb[2].mxu0 }
 0x10a   : > { %v2904_v39 = vadd.f32 %v1870_v36, %v1832_v17  ;;  %v1871_v40 = vpop.f32.mrb[2].mxu1  ;;  %v1834_v41 = vpop.f32.mrb[3].mxu0 }
 0x10b   : > { %v1835_v43 = vadd.f32 %v1834_v41, %v1833_v38  ;;  %v1872_v44 = vpop.f32.mrb[3].mxu1 }
 0x10c   : > { %v1873_v45 = vadd.f32 %v1872_v44, %v1871_v40  ;;  %v1006_v47 = vmul.f32 %v1000_v37, %v2904_v39  ;;  %v986_v49 = vmul.f32 %v2900_v30, %v2904_v39  ;;  %v1026_v53 = vmul.f32 %v2896_v28, %v2904_v39  ;;  %v874_v17 = vpop.permute.xlu1 %873 }
 0x10d   : > { %v1046_v54 = vmul.f32 %v1040_v52, %v2904_v39  ;;  %v1086_v56 = vmul.f32 %v1080_v55, %v2904_v39  ;;  %v1066_v57 = vmul.f32 %v1060_v48, %v2904_v39  ;;  %v856_v36 = vmul.f32 %v850_v16, %v2904_v39 }
 0x10e   : > { %v2909_v51 = vadd.f32 %v1873_v45, %v1835_v43  ;;  %1010 = vrot.lane.b32.xlu1 %v1006_v47, %s2308_s22  ;;  %990 = vrot.lane.b32.xlu0 %v986_v49, %s2309_s25  ;;  %v876_v41 = vmul.f32 %v870_v1, %v2904_v39 }
 0x110   : > { %v1007_v59 = vmul.f32 %v2898_v29, %v2909_v51  ;;  %v987_v60 = vmul.f32 %v2894_v27, %v2909_v51  ;;  %v1027_v62 = vmul.f32 %v2902_v34, %v2909_v51  ;;  %v1047_v0 = vmul.f32 %v1044_v58, %v2909_v51  ;;  %v894_v38 = vpop.permute.xlu1 %893 }
 0x111   : > { %v1067_v3 = vmul.f32 %v1064_v63, %v2909_v51  ;;  %v1087_v5 = vmul.f32 %v1084_v4, %v2909_v51  ;;  %v857_v35 = vmul.f32 %v854_v26, %v2909_v51  ;;  %v877_v40 = vmul.f32 %v874_v17, %v2909_v51 }
 0x112   : > { %1030 = vrot.lane.b32.xlu1 %v1026_v53, %s2310_s21  ;;  %1050 = vrot.lane.b32.xlu0 %v1046_v54, %s2311_s26  ;;  %v897_v43 = vmul.f32 %v894_v38, %v2909_v51 }
 0x116   : > { %1090 = vrot.lane.b32.xlu1 %v1086_v56, %s2312_s27  ;;  %1070 = vrot.lane.b32.xlu0 %v1066_v57, %s2313_s29 }
 0x11a   : > { %1012 = vrot.lane.b32.xlu1 %v1007_v59, %s2308_s22  ;;  %992 = vrot.lane.b32.xlu0 %v987_v60, %s2309_s25 }
 0x11e   : > { %1032 = vrot.lane.b32.xlu1 %v1027_v62, %s2310_s21  ;;  %1052 = vrot.lane.b32.xlu0 %v1047_v0, %s2311_s26 }
 0x122   : > { %1072 = vrot.lane.b32.xlu1 %v1067_v3, %s2313_s29  ;;  %1092 = vrot.lane.b32.xlu0 %v1087_v5, %s2312_s27 }
 0x125   : > { %v1906_v6 = vpop.f32.mrb[4].mxu0 }
 0x126   : > { %v1944_v7 = vpop.f32.mrb[4].mxu1  ;;  %v1907_v8 = vpop.f32.mrb[5].mxu0 }
 0x127   : > { %v1908_v9 = vadd.f32 %v1907_v8, %v1906_v6  ;;  %v1945_v10 = vpop.f32.mrb[5].mxu1 }
 0x128   : > { %v1946_v11 = vadd.f32 %v1945_v10, %v1944_v7 }
 0x129   : > { %v1909_v12 = vpop.f32.mrb[6].mxu0 }
 0x12a   : > { %v2937_v13 = vadd.f32 %v1946_v11, %v1908_v9  ;;  %v1947_v14 = vpop.f32.mrb[6].mxu1  ;;  %v1910_v15 = vpop.f32.mrb[7].mxu0 }
 0x12b   : > { %v1911_v19 = vadd.f32 %v1910_v15, %v1909_v12  ;;  %v1948_v20 = vpop.f32.mrb[7].mxu1 }
 0x12c   : > { %v1949_v21 = vadd.f32 %v1948_v20, %v1947_v14  ;;  %v1228_v22 = vmul.f32 %v2900_v30, %v2937_v13  ;;  %v1240_v42 = vmul.f32 %v1000_v37, %v2937_v13  ;;  %v1252_v50 = vmul.f32 %v2896_v28, %v2937_v13 }
 0x12d   : > { %v1264_v61 = vmul.f32 %v1040_v52, %v2937_v13  ;;  %v1276_v25 = vmul.f32 %v1060_v48, %v2937_v13 }
 0x12e   : > { %v2942_v46 = vadd.f32 %v1949_v21, %v1911_v19  ;;  %1232 = vrot.lane.b32.xlu1 %v1228_v22, %s2309_s25  ;;  %1244 = vrot.lane.b32.xlu0 %v1240_v42, %s2308_s22 }
 0x130   : > { %v1241_v2 = vmul.f32 %v2898_v29, %v2942_v46  ;;  %v1253_v28 = vmul.f32 %v2902_v34, %v2942_v46  ;;  %v1229_v30 = vmul.f32 %v2894_v27, %v2942_v46  ;;  %v1265_v31 = vmul.f32 %v1044_v58, %v2942_v46  ;;  %v2972_v27 = vpop.permute.xlu0 %969 }
 0x131   : > { %v1288_v29 = vmul.f32 %v1080_v55, %v2937_v13  ;;  %v1277_v33 = vmul.f32 %v1064_v63, %v2942_v46  ;;  %v1289_v34 = vmul.f32 %v1084_v4, %v2942_v46  ;;  %v1166_v58 = vmul.f32 %v870_v1, %v2937_v13 }
 0x132   : > { %1256 = vrot.lane.b32.xlu1 %v1252_v50, %s2310_s21  ;;  %1268 = vrot.lane.b32.xlu0 %v1264_v61, %s2311_s26  ;;  %v1155_v62 = vmul.f32 %v854_v26, %v2942_v46  ;;  %v1179_v0 = vmul.f32 %v894_v38, %v2942_v46  ;;  %v1167_v5 = vmul.f32 %v874_v17, %v2942_v46 }
 0x133   : > { %v976_v9 = vmul.f32 %v2972_v27, %v2904_v39  ;;  %v977_v61 = vmul.f32 %v2964_v32, %v2909_v51 }
 0x134   : > { %v890_v37 = vpop.permute.xlu0 %889 }
 0x135   : > { %v896_v44 = vmul.f32 %v890_v37, %v2904_v39  ;;  %v1178_v60 = vmul.f32 %v890_v37, %v2937_v13 }
 0x136   : > { %1246 = vrot.lane.b32.xlu1 %v1241_v2, %s2308_s22  ;;  %1280 = vrot.lane.b32.xlu0 %v1276_v25, %s2313_s29 }
 0x13a   : > { %1258 = vrot.lane.b32.xlu1 %v1253_v28, %s2310_s21  ;;  %1234 = vrot.lane.b32.xlu0 %v1229_v30, %s2309_s25 }
 0x13e   : > { %1270 = vrot.lane.b32.xlu1 %v1265_v31, %s2311_s26  ;;  %1292 = vrot.lane.b32.xlu0 %v1288_v29, %s2312_s27 }
 0x142   : > { %1282 = vrot.lane.b32.xlu1 %v1277_v33, %s2313_s29  ;;  %1294 = vrot.lane.b32.xlu0 %v1289_v34, %s2312_s27 }
 0x146   : > { %838 = vperm.xlu1 %2195, %v2785_v18   ;;  %843 = vperm.xlu0 %2196, %v2753_v23   ;;  %v910_v23 = vpop.permute.xlu0 %909  ;;  %v930_v18 = vpop.permute.xlu1 %929 }
 0x147   : > { %v916_v47 = vmul.f32 %v910_v23, %v2904_v39  ;;  %v936_v49 = vmul.f32 %v930_v18, %v2904_v39  ;;  %v1190_v59 = vmul.f32 %v910_v23, %v2937_v13  ;;  %v1202_v63 = vmul.f32 %v930_v18, %v2937_v13 }
 0x14a   : > { %862 = vrot.lane.b32.xlu0 %v857_v35, %s2309_s25  ;;  %860 = vrot.lane.b32.xlu1 %v856_v36, %s2309_s25  ;;  %v914_v45 = vpop.permute.xlu1 %913  ;;  %v950_v48 = vpop.permute.xlu0 %949  ;;  %v1226_v35 = vmul.f32 %v2972_v27, %v2937_v13 }
 0x14b   : > { %2197 = vset.pattern.permute.xlu0 %v2299_v24  ;;  %v1154_v24 = vmul.f32 %v850_v16, %v2937_v13  ;;  %v956_v52 = vmul.f32 %v950_v48, %v2904_v39  ;;  %v917_v54 = vmul.f32 %v914_v45, %v2909_v51  ;;  %v1214_v3 = vmul.f32 %v950_v48, %v2937_v13 }
 0x14c   : > { %v1191_v4 = vmul.f32 %v914_v45, %v2942_v46 }
 0x14e   : > { %882 = vrot.lane.b32.xlu0 %v877_v40, %s2308_s22  ;;  %880 = vrot.lane.b32.xlu1 %v876_v41, %s2308_s22  ;;  %v934_v53 = vpop.permute.xlu1 %933  ;;  %v954_v56 = vpop.permute.xlu0 %953 }
 0x14f   : > { %v937_v55 = vmul.f32 %v934_v53, %v2909_v51  ;;  %v957_v57 = vmul.f32 %v954_v56, %v2909_v51  ;;  %v1203_v6 = vmul.f32 %v934_v53, %v2942_v46  ;;  %v1215_v7 = vmul.f32 %v954_v56, %v2942_v46 }
 0x152   : > { %902 = vrot.lane.b32.xlu0 %v897_v43, %s2310_s21  ;;  %900 = vrot.lane.b32.xlu1 %v896_v44, %s2310_s21 }
 0x156   : > { %1158 = vrot.lane.b32.xlu0 %v1154_v24, %s2309_s25  ;;  %920 = vrot.lane.b32.xlu1 %v916_v47, %s2311_s26  ;;  %v1227_v24 = vmul.f32 %v2964_v32, %v2942_v46 }
 0x15a   : > { %960 = vrot.lane.b32.xlu0 %v956_v52, %s2312_s27  ;;  %940 = vrot.lane.b32.xlu1 %v936_v49, %s2313_s29 }
 0x15e   : > { %942 = vrot.lane.b32.xlu0 %v937_v55, %s2313_s29  ;;  %922 = vrot.lane.b32.xlu1 %v917_v54, %s2311_s26 }
 0x162   : > { %962 = vrot.lane.b32.xlu0 %v957_v57, %s2312_s27  ;;  %1170 = vrot.lane.b32.xlu1 %v1166_v58, %s2308_s22 }
 0x166   : > { %1194 = vrot.lane.b32.xlu0 %v1190_v59, %s2311_s26  ;;  %1182 = vrot.lane.b32.xlu1 %v1178_v60, %s2310_s21 }
 0x16a   : > { %1160 = vrot.lane.b32.xlu0 %v1155_v62, %s2309_s25  ;;  %1206 = vrot.lane.b32.xlu1 %v1202_v63, %s2313_s29  ;;  %s1797_s25 = sshll.u32 %s2394_s17, 10  ;;  %s3230_s17 = scalar_lea.sflag [#allocation3], %s350_s18 }
 0x16e   : > { %1184 = vrot.lane.b32.xlu0 %v1179_v0, %s2310_s21  ;;  %1218 = vrot.lane.b32.xlu1 %v1214_v3, %s2312_s27 }
 0x172   : > { %1196 = vrot.lane.b32.xlu0 %v1191_v4, %s2311_s26  ;;  %1172 = vrot.lane.b32.xlu1 %v1167_v5, %s2308_s22  ;;  %s352_s22 = scalar_lea.vmem [#allocation2], %s1776_s20  ;;  %s2236_s20 = scalar_lea.vmem %s2235_s12, 2048 }
 0x173   : > { %s1710_s21 = sshll.u32 %s352_s22, 4  ;;  %s3224_s21 = int_to_ptr.vmem [resolvable:$true] %s1710_s21 }
 0x174   : > { %s2230_s11 = scalar_lea.vmem %s3224_s21, 1024  ;;  %p2237_p0 = scmp.lt.s32.totalorder %s3224_s21, %s2235_s12 }
 0x175   : > { %p2231_p11 = scmp.ne.s32.totalorder %s3224_s21, %s2230_s11  ;;  %p2238_p1 = scmp.lt.s32.totalorder %s2236_s20, %s2230_s11 }
 0x176   : > { %1208 = vrot.lane.b32.xlu0 %v1203_v6, %s2313_s29  ;;  %s3222_s29 = scalar_lea.hbm %s3281_s10, %s1797_s25 }
 0x177   : > { %p2232_p12 = pnand %p2231_p11, %p2411_p5  ;;  %p2239_p2 = por %p2238_p1, %p2237_p0 }
 0x179   : > { %p2233_p13 = pneg %p2232_p12 }
 0x17a   : > { %1220 = vrot.lane.b32.xlu0 %v1215_v7, %s2312_s27 }
 0x17b   : > { %p2240_p3 = pnand %p2239_p2, %p2233_p13 }
 0x180   : > { %v1011_v8 = vpop.permute.xlu1 %1010  ;;  %v991_v10 = vpop.permute.xlu0 %990 }
 0x181   : > { %v996_v11 = vadd.f32 %v991_v10, %v976_v9 }
 0x183   : > { %v1016_v14 = vadd.f32 %v1011_v8, %v996_v11 }
 0x184   : > { %v1031_v12 = vpop.permute.xlu1 %1030  ;;  %v1051_v15 = vpop.permute.xlu0 %1050 }
 0x185   : > { %v1036_v16 = vadd.f32 %v1031_v12, %v1016_v14 }
 0x187   : > { %v1056_v19 = vadd.f32 %v1051_v15, %v1036_v16 }
 0x188   : > { %v1091_v20 = vpop.permute.xlu1 %1090  ;;  %v1071_v21 = vpop.permute.xlu0 %1070 }
 0x189   : > { %v1076_v22 = vadd.f32 %v1071_v21, %v1056_v19 }
 0x18b   : > { %v1096_v42 = vadd.f32 %v1091_v20, %v1076_v22 }
 0x18c   : > { %v1013_v50 = vpop.permute.xlu1 %1012  ;;  %v993_v1 = vpop.permute.xlu0 %992 }
 0x18d   : > { %v997_v2 = vadd.f32 %v993_v1, %v977_v61  ;;  %1100 = vrot.lane.b32.xlu1 %v1096_v42, %s2312_s27 }
 0x18f   : > { %v1017_v26 = vadd.f32 %v1013_v50, %v997_v2 }
 0x190   : > { %v1033_v25 = vpop.permute.xlu1 %1032  ;;  %v1053_v28 = vpop.permute.xlu0 %1052 }
 0x191   : > { %v1037_v30 = vadd.f32 %v1033_v25, %v1017_v26 }
 0x193   : > { %v1057_v31 = vadd.f32 %v1053_v28, %v1037_v30 }
 0x194   : > { %v1073_v29 = vpop.permute.xlu1 %1072  ;;  %v1093_v34 = vpop.permute.xlu0 %1092 }
 0x195   : > { %v1077_v33 = vadd.f32 %v1073_v29, %v1057_v31 }
 0x197   : > { %v1097_v17 = vadd.f32 %v1093_v34, %v1077_v33 }
 0x199   : > { %1102 = vrot.lane.b32.xlu1 %v1097_v17, %s2312_s27 }
 0x1a0   : > { %v1233_v36 = vpop.permute.xlu1 %1232  ;;  %v1245_v37 = vpop.permute.xlu0 %1244 }
 0x1a1   : > { %v1238_v38 = vadd.f32 %v1233_v36, %v1226_v35 }
 0x1a3   : > { %v1250_v40 = vadd.f32 %v1245_v37, %v1238_v38 }
 0x1a4   : > { %v1257_v41 = vpop.permute.xlu1 %1256  ;;  %v1269_v23 = vpop.permute.xlu0 %1268 }
 0x1a5   : > { %v1262_v18 = vadd.f32 %v1257_v41, %v1250_v40 }
 0x1a7   : > { %v1274_v45 = vadd.f32 %v1269_v23, %v1262_v18 }
 0x1a8   : > { %v1247_v43 = vpop.permute.xlu1 %1246  ;;  %v1281_v44 = vpop.permute.xlu0 %1280 }
 0x1a9   : > { %v1286_v52 = vadd.f32 %v1281_v44, %v1274_v45 }
 0x1ac   : > { %v1259_v47 = vpop.permute.xlu1 %1258  ;;  %v1235_v48 = vpop.permute.xlu0 %1234 }
 0x1ad   : > { %v1239_v49 = vadd.f32 %v1235_v48, %v1227_v24 }
 0x1af   : > { %v1251_v53 = vadd.f32 %v1247_v43, %v1239_v49 }
 0x1b0   : > { %v1271_v54 = vpop.permute.xlu1 %1270  ;;  %v1293_v27 = vpop.permute.xlu0 %1292 }
 0x1b1   : > { %v1263_v55 = vadd.f32 %v1259_v47, %v1251_v53  ;;  %v1298_v56 = vadd.f32 %v1293_v27, %v1286_v52 }
 0x1b3   : > { %v1275_v57 = vadd.f32 %v1271_v54, %v1263_v55  ;;  %1302 = vrot.lane.b32.xlu1 %v1298_v56, %s2312_s27 }
 0x1b4   : > { %v1283_v58 = vpop.permute.xlu1 %1282  ;;  %v1295_v60 = vpop.permute.xlu0 %1294 }
 0x1b5   : > { %v1287_v59 = vadd.f32 %v1283_v58, %v1275_v57 }
 0x1b7   : > { %v1299_v62 = vadd.f32 %v1295_v60, %v1287_v59 }
 0x1b9   : > { %1304 = vrot.lane.b32.xlu1 %v1299_v62, %s2312_s27 }
 0x1c5   : > { %v839_v63 = vpop.permute.xlu1 %838  ;;  %v844_v5 = vpop.permute.xlu0 %843 }
 0x1c6   : > { %v846_v15 = vmul.f32 %v839_v63, %v2904_v39  ;;  %v847_v61 = vmul.f32 %v844_v5, %v2909_v51  ;;  %v1152_v23 = vmul.f32 %v839_v63, %v2937_v13  ;;  %v1153_v43 = vmul.f32 %v844_v5, %v2942_v46 }
 0x1c9   : > { %v861_v32 = vpop.permute.xlu1 %860  ;;  %v863_v8 = vpop.permute.xlu0 %862 }
 0x1ca   : > { %v866_v19 = vadd.f32 %v861_v32, %v846_v15  ;;  %v867_v25 = vadd.f32 %v863_v8, %v847_v61  ;;  %v497_v61 = vld [vmem:[%s3279_s8 + $0x8] sm:$0xff] }
 0x1cd   : > { %v881_v0 = vpop.permute.xlu1 %880  ;;  %v883_v10 = vpop.permute.xlu0 %882 }
 0x1ce   : > { %v886_v20 = vadd.f32 %v881_v0, %v866_v19  ;;  %v887_v28 = vadd.f32 %v883_v10, %v867_v25 }
 0x1d1   : > { %v901_v3 = vpop.permute.xlu1 %900  ;;  %v903_v12 = vpop.permute.xlu0 %902 }
 0x1d2   : > { %v906_v22 = vadd.f32 %v901_v3, %v886_v20  ;;  %v907_v29 = vadd.f32 %v903_v12, %v887_v28  ;;  %v496_v28 = vld [vmem:[%s3279_s8] sm:$0xff] }
 0x1d5   : > { %v921_v4 = vpop.permute.xlu1 %920  ;;  %v1159_v16 = vpop.permute.xlu0 %1158 }
 0x1d6   : > { %v926_v50 = vadd.f32 %v921_v4, %v906_v22  ;;  %v1164_v44 = vadd.f32 %v1159_v16, %v1152_v23 }
 0x1d9   : > { %v941_v6 = vpop.permute.xlu1 %940  ;;  %v961_v42 = vpop.permute.xlu0 %960 }
 0x1da   : > { %v946_v1 = vadd.f32 %v941_v6, %v926_v50 }
 0x1dc   : > { %v966_v30 = vadd.f32 %v961_v42, %v946_v1  ;;  %v501_v1 = vld [vmem:[%s3279_s8 + $0x28] sm:$0xff] }
 0x1dd   : > { %v923_v7 = vpop.permute.xlu1 %922  ;;  %v943_v26 = vpop.permute.xlu0 %942  ;;  %v2078_v25 = vpack.c.bf16 %v501_v1, %v497_v61  ;;  %v525_v1 = vld [vmem:[%s3280_s9 + $0x68] sm:$0xff] }
 0x1de   : > { %v927_v34 = vadd.f32 %v923_v7, %v907_v29 }
 0x1df   : > { %2079 = vmatprep.subr.bf16.mxu0 %v2078_v25  ;;  %v527_v25 = vld [vmem:[%s3280_s9 + $0x78] sm:$0xff] }
 0x1e0   : > { %v947_v35 = vadd.f32 %v943_v26, %v927_v34  ;;  %v503_v26 = vld [vmem:[%s3279_s8 + $0x38] sm:$0xff] }
 0x1e1   : > { %v1171_v9 = vpop.permute.xlu1 %1170  ;;  %v963_v17 = vpop.permute.xlu0 %962 }
 0x1e2   : > { %v967_v51 = vadd.f32 %v963_v17, %v947_v35  ;;  %v1176_v45 = vadd.f32 %v1171_v9, %v1164_v44  ;;  %v505_v17 = vld [vmem:[%s3279_s8 + $0x48] sm:$0xff] }
 0x1e3   : > { %v509_v35 = vld [vmem:[%s3279_s8 + $0x68] sm:$0xff] }
 0x1e5   : > { %v1183_v11 = vpop.permute.xlu1 %1182  ;;  %v1195_v36 = vpop.permute.xlu0 %1194 }
 0x1e6   : > { %v1188_v47 = vadd.f32 %v1183_v11, %v1176_v45  ;;  %v2314_v45 = vmov 0.0  }
 0x1e7   : > { %1422 = vmatprep.mubr.f32.mxu0 %v2314_v45  ;;  %1499 = vmatprep.mubr.f32.mxu1 %v2314_v45 }
 0x1e8   : > { %v1200_v52 = vadd.f32 %v1195_v36, %v1188_v47  ;;  %v507_v36 = vld [vmem:[%s3279_s8 + $0x58] sm:$0xff]  ;;  %v517_v47 = vld [vmem:[%s3280_s9 + $0x28] sm:$0xff] }
 0x1e9   : > { %v1207_v14 = vpop.permute.xlu1 %1206  ;;  %v1161_v41 = vpop.permute.xlu0 %1160 }
 0x1ea   : > { %v1165_v24 = vadd.f32 %v1161_v41, %v1153_v43  ;;  %v1212_v27 = vadd.f32 %v1207_v14, %v1200_v52  ;;  %v510_v43 = vld [vmem:[%s3279_s8 + $0x70] sm:$0xff]  ;;  %v519_v52 = vld [vmem:[%s3280_s9 + $0x38] sm:$0xff] }
 0x1ed   : > { %v1219_v21 = vpop.permute.xlu1 %1218  ;;  %v1185_v18 = vpop.permute.xlu0 %1184 }
 0x1ee   : > { %v1224_v56 = vadd.f32 %v1219_v21, %v1212_v27 }
 0x1f1   : > { %v1173_v2 = vpop.permute.xlu1 %1172  ;;  %v1197_v49 = vpop.permute.xlu0 %1196 }
 0x1f2   : > { %v1177_v48 = vadd.f32 %v1173_v2, %v1165_v24  ;;  %v499_v2 = vld [vmem:[%s3279_s8 + $0x18] sm:$0xff]  ;;  %v513_v24 = vld [vmem:[%s3280_s9 + $0x8] sm:$0xff] }
 0x1f4   : > { %v1189_v53 = vadd.f32 %v1185_v18, %v1177_v48  ;;  %v506_v18 = vld [vmem:[%s3279_s8 + $0x50] sm:$0xff]  ;;  %v515_v48 = vld [vmem:[%s3280_s9 + $0x18] sm:$0xff] }
 0x1f5   : > { %v1209_v54 = vpop.permute.xlu0 %1208  ;;  %v2092_v44 = vpack.c.bf16 %v510_v43, %v506_v18  ;;  %v494_v18 = vld [vmem:[%s3278_s7] sm:$0xff] }
 0x1f6   : > { %v1201_v55 = vadd.f32 %v1197_v49, %v1189_v53  ;;  %v2094_v49 = vpack.c.bf16 %v517_v47, %v513_v24  ;;  %v2102_v53 = vpack.c.bf16 %v519_v52, %v515_v48  ;;  %v493_v47 = vld [vmem:[%s3277_s6 + $0x8] sm:$0xff] }
 0x1f8   : > { %v1213_v58 = vadd.f32 %v1209_v54, %v1201_v55 }
 0x1f9   : > { %v1221_v13 = vpop.permute.xlu0 %1220 }
 0x1fa   : > { %v1225_v46 = vadd.f32 %v1221_v13, %v1213_v58 }
 0x1ff   : > { %v1101_v31 = vpop.permute.xlu1 %1100 }
 0x200   : > { %v1107_v39 = vsel %vm1106_vm0, %v966_v30, %v1101_v31  ;;  %v500_v30 = vld [vmem:[%s3279_s8 + $0x20] sm:$0xff]  ;;  %v2086_v31 = vpack.c.bf16 %v503_v26, %v499_v2  ;;  %v523_v2 = vld [vmem:[%s3280_s9 + $0x58] sm:$0xff] }
 0x201   : > { %v1110_v33 = vsel %vm1109_vm1, %v1107_v39, 0.0  ;;  %v2080_v29 = vpack.c.bf16 %v500_v30, %v496_v28 }
 0x202   : > { %1111 = vadd.xlane.f32.xlu0 %v1110_v33  ;;  %v502_v33 = vld [vmem:[%s3279_s8 + $0x30] sm:$0xff]  ;;  %2087 = vmatprep.subr.bf16.mxu1 %v2086_v31 }
 0x203   : > { %2081 = vmatpush1.bf16.msra.mxu0 %v2080_v29  ;;  %v520_v29 = vld [vmem:[%s3280_s9 + $0x40] sm:$0xff] }
 0x20b   : > { %v1103_v37 = vpop.permute.xlu1 %1102 }
 0x20c   : > { %v1108_v38 = vsel %vm1106_vm0, %v967_v51, %v1103_v37  ;;  %v2082_v51 = vpack.c.bf16 %v509_v35, %v505_v17  ;;  %v511_v37 = vld [vmem:[%s3279_s8 + $0x78] sm:$0xff]  ;;  %v2106_v17 = vpack.c.bf16 %v527_v25, %v523_v2  ;;  %v524_v35 = vld [vmem:[%s3280_s9 + $0x60] sm:$0xff] }
 0x20d   : > { %v1113_v40 = vsel %vm1109_vm1, %v1108_v38, 0.0  ;;  %v2090_v41 = vpack.c.bf16 %v511_v37, %v507_v36  ;;  %v522_v36 = vld [vmem:[%s3280_s9 + $0x50] sm:$0xff]  ;;  %v2100_v37 = vpack.c.bf16 %v524_v35, %v520_v29  ;;  %v2229_v35 = vld [vmem:[%s2581_s28 + $0x38] sm:$0xff] }
 0x20e   : > { %1114 = vadd.xlane.f32.xlu1 %v1113_v40  ;;  %v508_v40 = vld [vmem:[%s3279_s8 + $0x60] sm:$0xff]  ;;  %2083 = vmatprep.subr.bf16.mxu0 %v2082_v51  ;;  %v526_v51 = vld [vmem:[%s3280_s9 + $0x70] sm:$0xff] }
 0x225   : > { %v1303_v57 = vpop.permute.xlu1 %1302 }
 0x226   : > { %v1308_v59 = vsel %vm1106_vm0, %v1224_v56, %v1303_v57 }
 0x227   : > { %v1310_v60 = vsel %vm1109_vm1, %v1308_v59, 0.0 }
 0x228   : > { %1311 = vadd.xlane.f32.xlu0 %v1310_v60 }
 0x22b   : > { %v1305_v62 = vpop.permute.xlu1 %1304 }
 0x22c   : > { %v1309_v63 = vsel %vm1106_vm0, %v1225_v46, %v1305_v62  ;;  %v490_v46 = vld [vmem:[%s3276_s5] sm:$0xff] }
 0x22d   : > { %v1313_v32 = vsel %vm1109_vm1, %v1309_v63, 0.0 }
 0x22e   : > { %1314 = vadd.xlane.f32.xlu0 %v1313_v32 }
 0x28f   : > { %v1112_v0 = vpop.xlane.xlu0 %1111 }
 0x290   : > { %v1116_v3 = vmul.f32 0.03125, %v1112_v0 }
 0x292   : > { %v3049_v4 = vsub.f32 %v1107_v39, %v1116_v3  ;;  %v498_v39 = vld [vmem:[%s3279_s8 + $0x10] sm:$0xff]  ;;  %v489_v3 = vld [vmem:[%s3275_s4 + $0x8] sm:$0xff] }
 0x293   : > { %v2088_v34 = vpack.c.bf16 %v502_v33, %v498_v39 }
 0x294   : > { %v1120_v5 = vmul.f32 %v3049_v4, %v3049_v4 }
 0x295   : > { %2089 = vmatpush1.bf16.msra.mxu1 %v2088_v34 }
 0x296   : > { %v1122_v6 = vsel %vm1109_vm1, %v1120_v5, 0.0  ;;  %2091 = vmatprep.subr.bf16.mxu1 %v2090_v41  ;;  %v492_v41 = vld [vmem:[%s3277_s6] sm:$0xff] }
 0x297   : > { %1123 = vadd.xlane.f32.xlu1 %v1122_v6 }
 0x299   : > { %2093 = vmatpush1.bf16.msra.mxu1 %v2092_v44 }
 0x29a   : > { %2103 = vmatprep.subr.bf16.mxu1 %v2102_v53 }
 0x29b   : > { %v1115_v7 = vpop.xlane.xlu1 %1114 }
 0x29c   : > { %v1117_v8 = vmul.f32 0.03125, %v1115_v7 }
 0x29e   : > { %v3054_v9 = vsub.f32 %v1108_v38, %v1117_v8  ;;  %v504_v38 = vld [vmem:[%s3279_s8 + $0x40] sm:$0xff] }
 0x29f   : > { %v2084_v23 = vpack.c.bf16 %v508_v40, %v504_v38  ;;  %v2108_v38 = vpack.c.bf16 %v526_v51, %v522_v36 }
 0x2a0   : > { %v1121_v10 = vmul.f32 %v3054_v9, %v3054_v9 }
 0x2a1   : > { %2085 = vmatpush1.bf16.msra.mxu0 %v2084_v23 }
 0x2a2   : > { %v1125_v11 = vsel %vm1109_vm1, %v1121_v10, 0.0  ;;  %2095 = vmatprep.subr.bf16.mxu0 %v2094_v49 }
 0x2a3   : > { %1126 = vadd.xlane.f32.xlu0 %v1125_v11 }
 0x2b5   : > { %v1312_v12 = vpop.xlane.xlu0 %1311 }
 0x2b6   : > { %v1316_v14 = vmul.f32 0.03125, %v1312_v12 }
 0x2b8   : > { %v3059_v15 = vsub.f32 %v1308_v59, %v1316_v14  ;;  %v488_v59 = vld [vmem:[%s3275_s4] sm:$0xff] }
 0x2ba   : > { %v1320_v16 = vmul.f32 %v3059_v15, %v3059_v15 }
 0x2bb   : > { %v1315_v19 = vpop.xlane.xlu0 %1314 }
 0x2bc   : > { %v1317_v20 = vmul.f32 0.03125, %v1315_v19  ;;  %v1322_v21 = vsel %vm1109_vm1, %v1320_v16, 0.0  ;;  %v512_v19 = vld [vmem:[%s3280_s9] sm:$0xff] }
 0x2bd   : > { %1323 = vadd.xlane.f32.xlu1 %v1322_v21  ;;  %v514_v21 = vld [vmem:[%s3280_s9 + $0x10] sm:$0xff] }
 0x2be   : > { %v3064_v22 = vsub.f32 %v1309_v63, %v1317_v20 }
 0x2c0   : > { %v1321_v42 = vmul.f32 %v3064_v22, %v3064_v22 }
 0x2c2   : > { %v1325_v50 = vsel %vm1109_vm1, %v1321_v42, 0.0  ;;  %v518_v42 = vld [vmem:[%s3280_s9 + $0x30] sm:$0xff] }
 0x2c3   : > { %1326 = vadd.xlane.f32.xlu0 %v1325_v50  ;;  %v521_v50 = vld [vmem:[%s3280_s9 + $0x48] sm:$0xff]  ;;  %v2104_v31 = vpack.c.bf16 %v518_v42, %v514_v21  ;;  %v2225_v21 = vld [vmem:[%s2581_s28 + $0x18] sm:$0xff] }
 0x2c4   : > { %v2098_v34 = vpack.c.bf16 %v525_v1, %v521_v50 }
 0x324   : > { %v1124_v54 = vpop.xlane.xlu1 %1123 }
 0x325   : > { %v1128_v27 = vmul.f32 0.03125, %v1124_v54 }
 0x327   : > { %v1130_v55 = vadd.f32 1e-05, %v1128_v27 }
 0x329   : > { %2198 = vrsqrt.f32 %v1130_v55 }
 0x330   : > { %v1127_v56 = vpop.xlane.xlu0 %1126 }
 0x331   : > { %v1129_v57 = vmul.f32 0.03125, %v1127_v56 }
 0x333   : > { %v2199_v58 = vpop.eup %2198  ;;  %v1131_v13 = vadd.f32 1e-05, %v1129_v57 }
 0x334   : > { %v1134_v60 = vmul.f32 %v2199_v58, %v3049_v4  ;;  %v491_v4 = vld [vmem:[%s3276_s5 + $0x8] sm:$0xff] }
 0x335   : > { %2200 = vrsqrt.f32 %v1131_v13 }
 0x336   : > { %v1136_v62 = vmul.f32 %v1134_v60, %v488_v59 }
 0x338   : > { %v1138_v63 = vadd.f32 %v1136_v62, %v490_v46 }
 0x33a   : > { %v1779_v32 = vmul.f32 -1.442695, %v1138_v63 }
 0x33c   : > { %2202 = vpow2.f32 %v1779_v32 }
 0x33f   : > { %v2201_v0 = vpop.eup %2200 }
 0x340   : > { %v1135_v5 = vmul.f32 %v2201_v0, %v3054_v9  ;;  %v516_v9 = vld [vmem:[%s3280_s9 + $0x20] sm:$0xff] }
 0x341   : > { %v2096_v30 = vpack.c.bf16 %v516_v9, %v512_v19  ;;  %v2224_v9 = vld [vmem:[%s2581_s28 + $0x8] sm:$0xff] }
 0x342   : > { %v1137_v6 = vmul.f32 %v1135_v5, %v489_v3 }
 0x344   : > { %v1139_v7 = vadd.f32 %v1137_v6, %v491_v4 }
 0x346   : > { %v2203_v8 = vpop.eup %2202  ;;  %v1780_v10 = vmul.f32 -1.442695, %v1139_v7 }
 0x347   : > { %v1146_v11 = vadd.f32 1.0, %v2203_v8 }
 0x348   : > { %2204 = vpow2.f32 %v1780_v10 }
 0x349   : > { %2206 = vrcp.f32 %v1146_v11 }
 0x34a   : > { %v1324_v12 = vpop.xlane.xlu1 %1323 }
 0x34b   : > { %v1328_v14 = vmul.f32 0.03125, %v1324_v12  ;;  %v2222_v12 = vld [vmem:[%s2581_s28] sm:$0xff] }
 0x34d   : > { %v1330_v16 = vadd.f32 1e-05, %v1328_v14 }
 0x34f   : > { %2208 = vrsqrt.f32 %v1330_v16  ;;  %v2223_v16 = vld [vmem:[%s2581_s28 + $0x10] sm:$0xff] }
 0x350   : > { %v1327_v20 = vpop.xlane.xlu0 %1326 }
 0x351   : > { %v1329_v61 = vmul.f32 0.03125, %v1327_v20 }
 0x352   : > { %v2205_v26 = vpop.eup %2204 }
 0x353   : > { %v1331_v28 = vadd.f32 1e-05, %v1329_v61  ;;  %v2207_v39 = vpop.eup %2206  ;;  %v1147_v33 = vadd.f32 1.0, %v2205_v26 }
 0x354   : > { %1783 = vmatmul.mubr.msk.f32.vlgmr.msra.gmra.mrb[8].mxu0 %vm1109_vm1, %v2207_v39  ;;  %1785 = vmatmul.mubr.msk.f32.vlgmr.msra.gmra.mrb[8].mxu1 %vm1109_vm1, %v2207_v39  ;;  %v2227_v39 = vld [vmem:[%s2581_s28 + $0x30] sm:$0xff] }
 0x355   : > { %2210 = vrsqrt.f32 %v1331_v28  ;;  %1428 = vmatprep.mubr.f32.mxu0 %v2314_v45  ;;  %1505 = vmatprep.mubr.f32.mxu1 %v2314_v45 }
 0x356   : > { %2212 = vrcp.f32 %v1147_v33  ;;  %2097 = vmatpush1.bf16.msra.mxu0 %v2096_v30  ;;  %2105 = vmatpush1.bf16.msra.mxu1 %v2104_v31  ;;  %v2226_v31 = vld [vmem:[%s2581_s28 + $0x20] sm:$0xff] }
 0x357   : > { %2099 = vmatprep.subr.bf16.mxu0 %v2098_v34  ;;  %2107 = vmatprep.subr.bf16.mxu1 %v2106_v17  ;;  %v2228_v34 = vld [vmem:[%s2581_s28 + $0x28] sm:$0xff] }
 0x359   : > { %v2209_v40 = vpop.eup %2208 }
 0x35a   : > { %v1334_v23 = vmul.f32 %v2209_v40, %v3059_v15  ;;  %2101 = vmatpush1.bf16.msra.mxu0 %v2100_v37  ;;  %2109 = vmatpush1.bf16.msra.mxu1 %v2108_v38  ;;  %v495_v15 = vld [vmem:[%s3278_s7 + $0x8] sm:$0xff] }
 0x35c   : > { %v1336_v43 = vmul.f32 %v1334_v23, %v492_v41 }
 0x35e   : > { %v1338_v44 = vadd.f32 %v1336_v43, %v494_v18 }
 0x35f   : > { %v2211_v24 = vpop.eup %2210 }
 0x360   : > { %v2213_v48 = vpop.eup %2212  ;;  %v1781_v49 = vmul.f32 -1.442695, %v1338_v44  ;;  %v1335_v52 = vmul.f32 %v2211_v24, %v3064_v22 }
 0x361   : > { %1784 = vmatmul.mubr.msk.f32.gmra.mrb[10].mxu0 %vm1109_vm1, %v2213_v48  ;;  %1786 = vmatmul.mubr.msk.f32.gmra.mrb[10].mxu1 %vm1109_vm1, %v2213_v48 }
 0x362   : > { %2214 = vpow2.f32 %v1781_v49  ;;  %v1337_v53 = vmul.f32 %v1335_v52, %v493_v47  ;;  %1582 = vmatprep.mubr.f32.mxu0 %v2314_v45  ;;  %1659 = vmatprep.mubr.f32.mxu1 %v2314_v45 }
 0x364   : > { %v1339_v54 = vadd.f32 %v1337_v53, %v495_v15 }
 0x366   : > { %v1782_v27 = vmul.f32 -1.442695, %v1339_v54 }
 0x368   : > { %2216 = vpow2.f32 %v1782_v27 }
 0x36c   : > { %v2215_v55 = vpop.eup %2214 }
 0x36d   : > { %v1346_v56 = vadd.f32 1.0, %v2215_v55 }
 0x36f   : > { %2218 = vrcp.f32 %v1346_v56 }
 0x372   : > { %v2217_v22 = vpop.eup %2216 }
 0x373   : > { %v1347_v57 = vadd.f32 1.0, %v2217_v22 }
 0x375   : > { %2220 = vrcp.f32 %v1347_v57 }
 0x379   : > { %v2219_v58 = vpop.eup %2218 }
 0x37a   : > { %1787 = vmatmul.mubr.msk.f32.vlgmr.msra.gmra.mrb[12].mxu0 %vm1109_vm1, %v2219_v58  ;;  %1789 = vmatmul.mubr.msk.f32.vlgmr.msra.gmra.mrb[12].mxu1 %vm1109_vm1, %v2219_v58 }
 0x37b   : > { %1588 = vmatprep.mubr.f32.mxu0 %v2314_v45  ;;  %1665 = vmatprep.mubr.f32.mxu1 %v2314_v45 }
 0x37f   : > { %v2221_v59 = vpop.eup %2220 }
 0x380   : > { %1788 = vmatmul.mubr.msk.f32.gmra.mrb[14].mxu0 %vm1109_vm1, %v2221_v59  ;;  %1790 = vmatmul.mubr.msk.f32.gmra.mrb[14].mxu1 %vm1109_vm1, %v2221_v59 }
 0x427   : > { %v1424_v13 = vpop.f32.mrb[8].mxu0  ;;  %v1501_v60 = vpop.f32.mrb[8].mxu1 }
 0x428   : > { %v1426_v46 = vpop.f32.mrb[9].mxu0  ;;  %v1503_v62 = vpop.f32.mrb[9].mxu1 }
 0x434   : > { %v1430_v63 = vpop.f32.mrb[10].mxu0  ;;  %v1507_v32 = vpop.f32.mrb[10].mxu1 }
 0x435   : > { %v1432_v0 = vpop.f32.mrb[11].mxu0  ;;  %v1509_v3 = vpop.f32.mrb[11].mxu1 }
 0x44d   : > { %v1584_v45 = vpop.f32.mrb[12].mxu0  ;;  %v1661_v5 = vpop.f32.mrb[12].mxu1 }
 0x44e   : > { %v1672_v4 = vmul.f32 %v1584_v45, %v1424_v13  ;;  %v1674_v6 = vmul.f32 %v1661_v5, %v1501_v60  ;;  %v1586_v7 = vpop.f32.mrb[13].mxu0  ;;  %v1663_v8 = vpop.f32.mrb[13].mxu1 }
 0x44f   : > { %v1673_v10 = vmul.f32 %v1586_v7, %v1426_v46  ;;  %v1675_v11 = vmul.f32 %v1663_v8, %v1503_v62 }
 0x450   : > { %v1680_v14 = vmul.f32 %v2222_v12, %v1672_v4  ;;  %v1682_v19 = vmul.f32 %v2223_v16, %v1674_v6 }
 0x451   : > { %v1681_v20 = vmul.f32 %v2224_v9, %v1673_v10  ;;  %v1683_v42 = vmul.f32 %v2225_v21, %v1675_v11 }
 0x452   : > { %1688 = vst [vmem:[%s352_s22] sm:$0xff] %v1680_v14  ;;  %1690 = vst [vmem:[%s352_s22 + $0x10] sm:$0xff] %v1682_v19 }
 0x453   : > { %1689 = vst [vmem:[%s352_s22 + $0x8] sm:$0xff] %v1681_v20  ;;  %1691 = vst [vmem:[%s352_s22 + $0x18] sm:$0xff] %v1683_v42  ;;  %v1590_v50 = vpop.f32.mrb[14].mxu0  ;;  %v1667_v61 = vpop.f32.mrb[14].mxu1 }
 0x454   : > { %v1676_v1 = vmul.f32 %v1590_v50, %v1430_v63  ;;  %v1678_v2 = vmul.f32 %v1667_v61, %v1507_v32  ;;  %v1592_v25 = vpop.f32.mrb[15].mxu0  ;;  %v1669_v26 = vpop.f32.mrb[15].mxu1 }
 0x455   : > { %v1677_v28 = vmul.f32 %v1592_v25, %v1432_v0  ;;  %v1679_v30 = vmul.f32 %v1669_v26, %v1509_v3 }
 0x456   : > { %v1684_v29 = vmul.f32 %v2226_v31, %v1676_v1  ;;  %v1686_v33 = vmul.f32 %v2227_v39, %v1678_v2 }
 0x457   : > { %v1685_v17 = vmul.f32 %v2228_v34, %v1677_v28  ;;  %v1687_v36 = vmul.f32 %v2229_v35, %v1679_v30 }
 0x458   : > { %1692 = vst [vmem:[%s352_s22 + $0x20] sm:$0xff] %v1684_v29  ;;  %1694 = vst [vmem:[%s352_s22 + $0x30] sm:$0xff] %v1686_v33 }
 0x459   : > { %1693 = vst [vmem:[%s352_s22 + $0x28] sm:$0xff] %v1685_v17  ;;  %1695 = vst [vmem:[%s352_s22 + $0x38] sm:$0xff] %v1687_v36 }
 0x45a   : > { %2243 = shalt.err (!%p2240_p3)
}
 0x45b   : > { %s2244_s28 = scalar_lea.hbm %s3222_s29, 1024  ;;  %s2248_s25 = scalar_lea.hbm %s3281_s10, 2048 }
 0x45c   : > { %p2245_p4 = scmp.ne.s32.totalorder %s3222_s29, %s2244_s28  ;;  %p2249_p9 = scmp.lt.u32.totalorder %s3222_s29, %s3281_s10 }
 0x45d   : > { %p2250_p10 = scmp.lt.u32.totalorder %s2248_s25, %s2244_s28  ;;  %p2252_p12 = scmp.lt.u32.totalorder %s2244_s28, %s3222_s29 }
 0x45e   : > { %p2246_p7 = pnand %p2245_p4, %p2411_p5 }
 0x45f   : > { %p2251_p11 = por %p2250_p10, %p2249_p9 }
 0x460   : > { %p2247_p8 = pneg %p2246_p7 }
 0x461   : > { %p2253_p13 = por %p2252_p12, %p2251_p11 }
 0x463   : > { %p2254_p0 = pnand %p2253_p13, %p2247_p8 }
 0x465   : > { %2257 = shalt.err (!%p2254_p0)
}
 0x466   : > { %s2316_s11 = smov 512   ;;  %s2317_s30 = smov 32  }
 0x467   : > { %2110 = dma.vmem_to_hbm [thread:$0]  (%p2411_p5), %s3224_s21, 1024, %s3222_s29, %s3230_s17, %s2316_s11, %s2316_s11, %s2317_s30  }
 0x468 PF: > { %p2116_p1 = scmp.ge.s32.totalorder %s2292_s16, 2  ;;  %s1725_s12 = sand.u32 1, %s2280_s13  }
 0x469   : > { %s1726_s20 = scalar_lea.sflag [#allocation3], %s1725_s12 }
 0x46a   : > { %p2113_p2 = pnand %p2116_p1, %p2415_p6 }
 0x46c   : > { %2275 = dma.done.wait (!%p2113_p2), %s1726_s20, 1024  }
 0x46d   : > { %2277 = vsyncadd (!%p2113_p2), %s1726_s20, 4294966272  ;;  %s3285_s28 = sld [smem:[#allocation5_spill]]  ;;  %p20_p3 = scmp.ge.s32.totalorder %s2398_s19, 4  }
 0x46e   : > { %s3286_s13 = smov %s2284_s14  ;;  %s3287_s14 = smov %s2288_s15 }
 0x46f   : > { %s3289_s16 = smov %s2398_s19  ;;  %22 = sbr.rel (!%p20_p3) target bundleno = 3 (0x3), region = 95 }
 0x473   : > { %s3288_s15 = smov %s3285_s28 }
 0x476   :  { %1731 = vsyncpa [#allocation3], 1 }
 0x477   :  { %1733 = vsyncpa [#allocation3 + $0x1], 1 }

</bundles_post_ra>
